<compile_context>
chip_gen: v6e
topology: v6e:2x2x1
jax: 0.10.0
libtpu: 0.0.40
codegen_flags: <defaults>
</compile_context>

<pallas_src>
import math

import jax
import jax.numpy as jnp
from jax import lax
from jax.experimental import pallas as pl
from jax.experimental.pallas import tpu as pltpu

_LANES = 128
_SUBLANES = 8
_STRIP_ROWS = 32               # inner fori_loop strip: 32 x 128 f32 = 4 vregs per value
_MAX_TILE_ROWS = 2048          # 2048 rows x 128 lanes = 131072 flat elems / stream / step
_MIN_PALLAS_N = 262144         # below this a pallas_call + packing is pure overhead

_DEG2RAD = math.pi / 180.0
_HALF_DEG2RAD = math.pi / 360.0   # deg->rad with the haversine /2 folded in
_EARTH_RADIUS_KM = 6371.0


def _round_up(x, m):
    return (x + m - 1) // m * m


def _haversine_pair_kernel(pred_ref, targ_ref, w_ref, out_ref):
    """One (tile_rows, 128) interleaved tile -> one (8, 128) partial sum of w * c/2.

    Lane layout (inherited from the row-major (N, 2) inputs):
      even lane 2j   -> lon of sample j of the row
      odd  lane 2j+1 -> lat of sample j of the row
    Weights are pre-packed onto the odd lanes (even lanes are exactly zero), so the
    per-sample result is assembled at the odd lanes and the garbage computed on the
    even lanes is annihilated by the zero weights.
    """
    # Direction probe for pltpu.roll (shift convention), resolved with vector ops only.
    lane_i = lax.broadcasted_iota(jnp.int32, (_STRIP_ROWS, _LANES), 1)
    lane = lane_i.astype(jnp.float32)
    prev_lane = jnp.where(lane_i == 0, jnp.float32(_LANES - 1), lane - 1.0)
    roll_is_np = pltpu.roll(lane, 1, axis=1) == prev_lane     # uniform bool tile

    n_strips = pred_ref.shape[0] // _STRIP_ROWS

    def body(i, acc):
        r0 = pl.multiple_of(i * _STRIP_ROWS, _STRIP_ROWS)
        p = pred_ref[pl.ds(r0, _STRIP_ROWS), :]
        t = targ_ref[pl.ds(r0, _STRIP_ROWS), :]
        w = w_ref[pl.ds(r0, _STRIP_ROWS), :]

        # sin((pred - targ)/2 rad): every lane useful (even = dlon/2, odd = dlat/2).
        s = jnp.sin((p - t) * jnp.float32(_HALF_DEG2RAD))
        s2 = s * s
        # cos(lat1 + lat2) on the odd lanes (even lanes compute a discarded value).
        cs = jnp.cos((p + t) * jnp.float32(_DEG2RAD))
        # cos(lat1)*cos(lat2) = 0.5*(1 - 2*sin^2(dlat/2) + cos(lat1+lat2))
        cc = jnp.float32(0.5) - s2 + jnp.float32(0.5) * cs

        # Bring sin^2(dlon/2) (even lane 2j) onto its sample's odd lane 2j+1.
        partner = jnp.where(roll_is_np,
                            pltpu.roll(s2, 1, axis=1),
                            pltpu.roll(s2, _LANES - 1, axis=1))

        a = jnp.clip(s2 + cc * partner, 0.0, 1.0)   # valid at odd lanes; guard sqrt(1-a)
        half_c = jnp.arctan2(jnp.sqrt(a), jnp.sqrt(jnp.float32(1.0) - a))
        wd = half_c * w                              # even lanes -> exactly 0

        # Fold the strip into the (8, 128) accumulator: pure VPU adds, no XLU reduce.
        return acc + jnp.sum(
            wd.reshape(_STRIP_ROWS // _SUBLANES, _SUBLANES, _LANES), axis=0)

    acc = lax.fori_loop(0, n_strips, body,
                        jnp.zeros((_SUBLANES, _LANES), jnp.float32))
    out_ref[0] = acc


def _pack_rows(flat, total_elems):
    """Pad a flat f32 vector to `total_elems` (skip if already aligned) and tile it."""
    pad = total_elems - flat.shape[0]
    if pad:
        flat = jnp.pad(flat, (0, pad))
    return flat.reshape(total_elems // _LANES, _LANES)


def _haversine_mean_jnp(predictions, targets, sample_weight):
    """Pure-JAX reference / small-N fast path (mirrors the PyTorch module)."""
    lat1, lon1 = jnp.deg2rad(targets[:, 1]), jnp.deg2rad(targets[:, 0])
    lat2, lon2 = jnp.deg2rad(predictions[:, 1]), jnp.deg2rad(predictions[:, 0])
    dlat, dlon = lat2 - lat1, lon2 - lon1
    a = jnp.sin(dlat / 2.0) ** 2 + jnp.cos(lat1) * jnp.cos(lat2) * jnp.sin(dlon / 2.0) ** 2
    a = jnp.clip(a, 0.0, 1.0)
    c = 2.0 * jnp.arctan2(jnp.sqrt(a), jnp.sqrt(1.0 - a))
    return jnp.mean(6371.0 * c * sample_weight)


def multiobjective_haversine_loss(predictions, targets, sample_weight=None,
                                  alpha=0.5, beta=0.5, gamma=0.5,
                                  composite_loss=False, force_pallas=False):
    """Forward pass of MultiobjectiveHaversineLoss (composite_loss=False)."""
    assert not composite_loss  # TODO(synk): see header note — composite branch is broken in the reference
    n = predictions.shape[0]
    predictions = predictions.astype(jnp.float32)   # keep f32: bf16 degrees lose resolution
    targets = targets.astype(jnp.float32)
    if sample_weight is None:
        sample_weight = jnp.ones((n,), jnp.float32)
    sample_weight = sample_weight.astype(jnp.float32).reshape(-1)

    if n < _MIN_PALLAS_N and not force_pallas:
        return _haversine_mean_jnp(predictions, targets, sample_weight)

    # Sample layout: 2*n flat elements -> (rows, 128) interleaved rows.
    rows = pl.cdiv(2 * n, _LANES)
    # Cap tile_rows so num_tiles >= 2 when possible (keeps both v7x TCs busy),
    # keep it a multiple of the strip size, and never exceed _MAX_TILE_ROWS.
    tile_rows = min(_MAX_TILE_ROWS, _round_up(pl.cdiv(rows, 2), _STRIP_ROWS))
    num_tiles = pl.cdiv(rows, tile_rows)
    rows_pad = num_tiles * tile_rows
    total = rows_pad * _LANES

    # Free reshapes of the row-major (N, 2) inputs; pad only when unaligned.
    pred_rows = _pack_rows(predictions.reshape(-1), total)
    targ_rows = _pack_rows(targets.reshape(-1), total)
    # Weights onto the odd lanes (even lanes zero); padded samples carry zero weight.
    w_odd = jnp.stack([jnp.zeros_like(sample_weight), sample_weight], axis=1).reshape(-1)
    w_rows = _pack_rows(w_odd, total)

    partials = pl.pallas_call(
        _haversine_pair_kernel,
        out_shape=jax.ShapeDtypeStruct((num_tiles, _SUBLANES, _LANES), jnp.float32),
        grid=(num_tiles,),
        in_specs=[
            pl.BlockSpec((tile_rows, _LANES), lambda i: (i, 0)),
            pl.BlockSpec((tile_rows, _LANES), lambda i: (i, 0)),
            pl.BlockSpec((tile_rows, _LANES), lambda i: (i, 0)),
        ],
        out_specs=pl.BlockSpec((1, _SUBLANES, _LANES), lambda i: (i, 0, 0)),
        compiler_params=pltpu.CompilerParams(
            dimension_semantics=("parallel",),      # v7x: split tiles across both TCs
            vmem_limit_bytes=32 * 1024 * 1024,      # ~6 MiB used at the largest tile
        ),
    )(pred_rows, targ_rows, w_rows)

    # Tiny cross-lane reduce + (2 * R / n) scale in XLA; divide by the ORIGINAL n.
    return jnp.sum(partials) * jnp.float32(2.0 * _EARTH_RADIUS_KM) / jnp.float32(n)


if __name__ == "__main__":
    key = jax.random.PRNGKey(0)
    # 8192: multi-tile grid, no padding; 2048: single tile, no padding, None weights;
    # 300: exercises the pad + zero-weight path.
    for n, use_weights in ((8192, True), (2048, False), (300, True)):
        k1, k2, k3, k4, k5 = jax.random.split(jax.random.fold_in(key, n), 5)
        predictions = jnp.stack([
            jax.random.uniform(k1, (n,), jnp.float32, -180.0, 180.0),   # lon
            jax.random.uniform(k2, (n,), jnp.float32, -90.0, 90.0),     # lat
        ], axis=1)
        targets = jnp.stack([
            jax.random.uniform(k3, (n,), jnp.float32, -180.0, 180.0),
            jax.random.uniform(k4, (n,), jnp.float32, -90.0, 90.0),
        ], axis=1)
        sample_weight = (jax.random.uniform(k5, (n,), jnp.float32, 0.5, 1.5)
                         if use_weights else None)

        loss = multiobjective_haversine_loss(predictions, targets, sample_weight,
                                             force_pallas=True)
        jax.block_until_ready(loss)

        ref_w = sample_weight if sample_weight is not None else jnp.ones((n,), jnp.float32)
        ref_loss = _haversine_mean_jnp(predictions, targets, ref_w)
        assert jnp.allclose(loss, ref_loss, rtol=1e-4, atol=1e-2), (n, loss, ref_loss)

    print("KERNEL_OK")
</pallas_src>

<mosaic_0001>
module attributes {stable_mosaic.version = 11 : i64} {
  func.func @_haversine_pair_kernel(%arg0: i32, %arg1: memref<64x128xf32, #tpu.memory_space<vmem>>, %arg2: memref<64x128xf32, #tpu.memory_space<vmem>>, %arg3: memref<64x128xf32, #tpu.memory_space<vmem>>, %arg4: memref<1x8x128xf32, #tpu.memory_space<vmem>>) attributes {dimension_semantics = [#tpu.dimension_semantics<parallel>], iteration_bounds = array<i64: 2>, scalar_prefetch = 0 : i64, scratch_operands = 0 : i64, tpu.core_type = #tpu.core_type<tc>, window_params = [{transform_indices = @transform_0, window_bounds = array<i64: 64, 128>}, {transform_indices = @transform_1, window_bounds = array<i64: 64, 128>}, {transform_indices = @transform_2, window_bounds = array<i64: 64, 128>}, {transform_indices = @transform_3, window_bounds = array<i64: 1, 8, 128>}]} {
    %0 = tpu.iota {dimensions = array<i32: 1>} : vector<32x128xi32>
    %1 = arith.sitofp %0 : vector<32x128xi32> to vector<32x128xf32>
    %c0_i32 = arith.constant 0 : i32
    %2 = vector.broadcast %c0_i32 : i32 to vector<32x128xi32>
    %3 = arith.cmpi eq, %0, %2 : vector<32x128xi32>
    %cst = arith.constant 1.000000e+00 : f32
    %4 = vector.broadcast %cst : f32 to vector<32x128xf32>
    %5 = arith.subf %1, %4 : vector<32x128xf32>
    %cst_0 = arith.constant 1.270000e+02 : f32
    %6 = vector.broadcast %cst_0 : f32 to vector<32x128xf32>
    %7 = arith.select %3, %6, %5 : vector<32x128xi1>, vector<32x128xf32>
    %c1_i32 = arith.constant 1 : i32
    %8 = tpu.dynamic_rotate %1 by %c1_i32 dim 1 : vector<32x128xf32>, i32 -> vector<32x128xf32>
    %9 = arith.cmpf oeq, %8, %7 : vector<32x128xf32>
    %cst_1 = arith.constant 0.000000e+00 : f32
    %10 = vector.broadcast %cst_1 : f32 to vector<8x128xf32>
    %c0_i32_2 = arith.constant 0 : i32
    %c2_i32 = arith.constant 2 : i32
    %11 = arith.addi %c0_i32_2, %c2_i32 : i32
    %c1_i32_3 = arith.constant 1 : i32
    %12 = scf.for %arg5 = %c0_i32_2 to %11 step %c1_i32_3 iter_args(%arg6 = %10) -> (vector<8x128xf32>)  : i32 {
      %c32_i32 = arith.constant 32 : i32
      %16 = arith.muli %arg5, %c32_i32 : i32
      %17 = tpu.assume_multiple %16, 32 : i32
      %18 = arith.index_cast %17 : i32 to index
      %c0_7 = arith.constant 0 : index
      %19 = vector.load %arg1[%18, %c0_7] : memref<64x128xf32, #tpu.memory_space<vmem>>, vector<32x128xf32>
      %20 = arith.index_cast %17 : i32 to index
      %c0_8 = arith.constant 0 : index
      %21 = vector.load %arg2[%20, %c0_8] : memref<64x128xf32, #tpu.memory_space<vmem>>, vector<32x128xf32>
      %22 = arith.index_cast %17 : i32 to index
      %c0_9 = arith.constant 0 : index
      %23 = vector.load %arg3[%22, %c0_9] : memref<64x128xf32, #tpu.memory_space<vmem>>, vector<32x128xf32>
      %24 = arith.subf %19, %21 : vector<32x128xf32>
      %cst_10 = arith.constant 0.00872664619 : f32
      %25 = vector.broadcast %cst_10 : f32 to vector<32x128xf32>
      %26 = arith.mulf %24, %25 : vector<32x128xf32>
      %27 = math.sin %26 : vector<32x128xf32>
      %28 = arith.mulf %27, %27 : vector<32x128xf32>
      %29 = arith.addf %19, %21 : vector<32x128xf32>
      %cst_11 = arith.constant 0.0174532924 : f32
      %30 = vector.broadcast %cst_11 : f32 to vector<32x128xf32>
      %31 = arith.mulf %29, %30 : vector<32x128xf32>
      %32 = math.cos %31 : vector<32x128xf32>
      %cst_12 = arith.constant 5.000000e-01 : f32
      %33 = vector.broadcast %cst_12 : f32 to vector<32x128xf32>
      %34 = arith.subf %33, %28 : vector<32x128xf32>
      %cst_13 = arith.constant 5.000000e-01 : f32
      %35 = vector.broadcast %cst_13 : f32 to vector<32x128xf32>
      %36 = arith.mulf %35, %32 : vector<32x128xf32>
      %37 = arith.addf %34, %36 : vector<32x128xf32>
      %c1_i32_14 = arith.constant 1 : i32
      %38 = tpu.dynamic_rotate %28 by %c1_i32_14 dim 1 : vector<32x128xf32>, i32 -> vector<32x128xf32>
      %c127_i32 = arith.constant 127 : i32
      %39 = tpu.dynamic_rotate %28 by %c127_i32 dim 1 : vector<32x128xf32>, i32 -> vector<32x128xf32>
      %40 = arith.select %9, %38, %39 : vector<32x128xi1>, vector<32x128xf32>
      %41 = arith.mulf %37, %40 : vector<32x128xf32>
      %42 = arith.addf %28, %41 : vector<32x128xf32>
      %cst_15 = arith.constant 0.000000e+00 : f32
      %cst_16 = arith.constant 1.000000e+00 : f32
      %43 = vector.broadcast %cst_15 : f32 to vector<32x128xf32>
      %44 = arith.maximumf %43, %42 : vector<32x128xf32>
      %45 = vector.broadcast %cst_16 : f32 to vector<32x128xf32>
      %46 = arith.minimumf %45, %44 : vector<32x128xf32>
      %47 = math.sqrt %46 : vector<32x128xf32>
      %cst_17 = arith.constant 1.000000e+00 : f32
      %48 = vector.broadcast %cst_17 : f32 to vector<32x128xf32>
      %49 = arith.subf %48, %46 : vector<32x128xf32>
      %50 = math.sqrt %49 : vector<32x128xf32>
      %51 = math.atan2 %47, %50 : vector<32x128xf32>
      %52 = arith.mulf %51, %23 : vector<32x128xf32>
      %53 = vector.shape_cast %52 : vector<32x128xf32> to vector<4x8x128xf32>
      %cst_18 = arith.constant dense<0.000000e+00> : vector<8x128xf32>
      %54 = vector.multi_reduction <add>, %53, %cst_18 [0] : vector<4x8x128xf32> to vector<8x128xf32>
      %55 = arith.addf %arg6, %54 : vector<8x128xf32>
      scf.yield %55 : vector<8x128xf32>
    }
    %c2_i32_4 = arith.constant 2 : i32
    %c0 = arith.constant 0 : index
    %c0_5 = arith.constant 0 : index
    %c0_6 = arith.constant 0 : index
    %13 = vector.load %arg4[%c0, %c0_5, %c0_6] : memref<1x8x128xf32, #tpu.memory_space<vmem>>, vector<1x8x128xf32>
    %14 = vector.shape_cast %13 : vector<1x8x128xf32> to vector<8x128xf32>
    %15 = vector.shape_cast %12 : vector<8x128xf32> to vector<1x8x128xf32>
    tpu.vector_store %arg4[%c0, %c0_5, %c0_6], %15 {strides = array<i32>} : memref<1x8x128xf32, #tpu.memory_space<vmem>>, vector<1x8x128xf32>,
    return
  }
  func.func @transform_0(%arg0: i32) -> (i32, i32) {
    %c0_i32 = arith.constant 0 : i32
    %c0_i32_0 = arith.constant 0 : i32
    return %arg0, %c0_i32 : i32, i32
  }
  func.func @transform_1(%arg0: i32) -> (i32, i32) {
    %c0_i32 = arith.constant 0 : i32
    %c0_i32_0 = arith.constant 0 : i32
    return %arg0, %c0_i32 : i32, i32
  }
  func.func @transform_2(%arg0: i32) -> (i32, i32) {
    %c0_i32 = arith.constant 0 : i32
    %c0_i32_0 = arith.constant 0 : i32
    return %arg0, %c0_i32 : i32, i32
  }
  func.func @transform_3(%arg0: i32) -> (i32, i32, i32) {
    %c0_i32 = arith.constant 0 : i32
    %c0_i32_0 = arith.constant 0 : i32
    %c0_i32_1 = arith.constant 0 : i32
    return %arg0, %c0_i32, %c0_i32_0 : i32, i32, i32
  }
}

</mosaic_0001>

<bundles_post_ra>
// kernel: tpu_custom_call.1
= control target key start
LH: loop header
LB: loop body
LE: loop exit
PB: predicated region body
PF: predicated region fallthrough
CT: control target
= control target key end

     0   :  { %s3173_s0 = inlined_call_operand.hbm [shape: f32[128,128], index: 0, kind: input, shape index: {}]   ;;  %s3174_s1 = inlined_call_operand.hbm [shape: f32[128,128], index: 1, kind: input, shape index: {}]   ;;  %s3175_s2 = inlined_call_operand.hbm [shape: f32[128,128], index: 2, kind: input, shape index: {}]   ;;  %s3176_s3 = inlined_call_operand.hbm [shape: f32[2,8,128], index: 3, kind: output, shape index: {}]  }
   0x1   :  { %3183 = sst [smem:[#allocation12_spill]] %s3173_s0 }
   0x2   :  { %3184 = sst [smem:[#allocation13_spill]] %s3174_s1 }
   0x3   :  { %8 = vsyncpa [#allocation3], 0 }
   0x4   :  { %10 = vsyncpa [#allocation3 + $0x1], 0 }
   0x5   :  { %11 = vsyncpa [#allocation6], 0 }
   0x6   :  { %13 = vsyncpa [#allocation6 + $0x1], 0 }
   0x7   :  { %14 = vsyncpa [#allocation4], 0 }
   0x8   :  { %16 = vsyncpa [#allocation4 + $0x1], 0  ;;  %s2033_s12 = smov 0   ;;  %s2035_s13 = smov 0  }
   0x9   :  { %s2037_s14 = smov 0   ;;  %s2039_s15 = smov 0  }
   0xa LB: > { %s2054_s16 = sadd.s32 4294967295, %s1986_s15   ;;  %s1595_s17 = sadd.s32 4294967294, %s1986_s15   ;;  %s1986_s15 = sphi %s2039_s15, %s3221_s15   ;;  %s1982_s14 = sphi %s2037_s14, %s3220_s14   ;;  %s1978_s13 = sphi %s2035_s13, %s3219_s13   ;;  %s1974_s12 = sphi %s2033_s12, %s3218_s12  }
   0xb   : > { %s2058_s18 = sadd.s32 1, %s1986_s15   ;;  %s29_s19 = sadd.s32 1, %s1982_s14 }
   0xc   : > { %s26_s20 = ssub.s32 %s1986_s15, %s2058_s18  ;;  %p36_p0 = scmp.ne.s32.totalorder %s1982_s14, %s1978_s13 }
   0xd   : > { %p27_p1 = scmp.eq.s32.totalorder %s26_s20, 0  ;;  %p37_p2 = scmp.eq.s32.totalorder %s1986_s15, 0 }
   0xe   : > { %p42_p3 = scmp.ne.s32.totalorder %s1978_s13, %s1974_s12  ;;  %p43_p4 = scmp.eq.s32.totalorder %s2054_s16, 0 }
   0xf   : > { %s2070_s21 = scalar_select %p27_p1, %s1982_s14, %s29_s19  }
  0x10   : > { %p38_p5 = por %p37_p2, %p36_p0  ;;  %p2072_p6 = por %p43_p4, %p42_p3 }
  0x11   : > { %p118_p7 = scmp.eq.s32.totalorder %s2054_s16, 1  ;;  %p124_p8 = scmp.eq.s32.totalorder %s1595_s17, 1 }
  0x12   : > { %s3185_s22 = scalar_select %p2072_p6, 1, 0 }
  0x13   : > { %p1707_p10 = scmp.lt.s32.totalorder %s1986_s15, 2  ;;  %p2079_p11 = por %p118_p7, %p36_p0 }
  0x14   : > { %p2083_p12 = por %p124_p8, %p42_p3  ;;  %s144_s25 = sand.u32 1, %s1982_s14  }
  0x15   : > { %s3186_s23 = scalar_select %p2079_p11, 1, 0 }
  0x16   : > { %s3187_s24 = scalar_select %p2083_p12, 1, 0 }
  0x17   : > { %s2089_s26 = sshll.u32 %s1986_s15, 10  ;;  %s2093_s27 = sshll.u32 %s144_s25, 6 }
  0x18   : > { %p2095_p13 = pnand %p1707_p10, %p38_p5  ;;  %s165_s29 = sand.u32 1, %s1986_s15  }
  0x19   : > { %s3189_s1 = sld [smem:[#allocation13_spill]]  ;;  %s169_s6 = scalar_lea.vmem [#allocation5], %s2093_s27 }
  0x1a   : > { %s176_s7 = sshll.u32 %s169_s6, 4  ;;  %s2110_s8 = scalar_lea.sflag [#allocation6], %s165_s29  ;;  %s2107_s7 = int_to_ptr.vmem [resolvable:$true] %s176_s7 }
  0x1b   : > { %p2116_p2 = pneg %p2095_p13 }
  0x1f   : > { %s2104_s5 = scalar_lea.hbm %s3189_s1, %s2089_s26  ;;  %s1831_s19 = scalar_lea.hbm %s3189_s1, 2048 }
  0x20   : > { %s1826_s9 = scalar_lea.hbm %s2104_s5, 1024  ;;  %p1832_p5 = scmp.lt.s32.totalorder %s2104_s5, %s3189_s1 }
  0x21   : > { %p1827_p1 = scmp.ne.s32.totalorder %s2104_s5, %s1826_s9  ;;  %p1833_p7 = scmp.lt.s32.totalorder %s1831_s19, %s1826_s9 }
  0x23   : > { %p1829_p3 = pnand %p2116_p2, %p1827_p1  ;;  %p1834_p8 = por %p1833_p7, %p1832_p5 }
  0x25   : > { %p1830_p4 = pneg %p1829_p3 }
  0x27   : > { %p1835_p10 = pnand %p1834_p8, %p1830_p4 }
  0x29   : > { %1838 = shalt.err (!%p1835_p10)
}
  0x2a   : > { %s1839_s29 = scalar_lea.vmem %s2107_s7, 1024  ;;  %s1996_s4 = smov [#allocation5]  }
  0x2b   : > { %p1840_p9 = scmp.ne.s32.totalorder %s2107_s7, %s1839_s29  ;;  %s1844_s6 = sshll.u32 %s1996_s4, 4  ;;  %s1845_s6 = int_to_ptr.vmem [resolvable:$false] %s1844_s6 }
  0x2c   : > { %s1846_s11 = scalar_lea.vmem %s1845_s6, 2048  ;;  %p1847_p0 = scmp.lt.s32.totalorder %s2107_s7, %s1845_s6 }
  0x2d   : > { %p1842_p1 = pnand %p1840_p9, %p2116_p2  ;;  %p1848_p12 = scmp.lt.s32.totalorder %s1846_s11, %s1839_s29 }
  0x2f   : > { %p1843_p3 = pneg %p1842_p1  ;;  %p1849_p11 = por %p1848_p12, %p1847_p0 }
  0x31   : > { %p1850_p6 = pnand %p1849_p11, %p1843_p3 }
  0x33   : > { %1853 = shalt.err (!%p1850_p6)
}
  0x34   : > { %s3179_s9 = smov 128   ;;  %s3181_s17 = smov 8  }
  0x35   : > { %1699 = dma.hbm_to_vmem [thread:$0]  (!%p2095_p13), %s2104_s5, 1024, %s2107_s7, %s2110_s8, %s3179_s9, %s3179_s9, %s3181_s17  }
  0x36   : > { %p205_p9 = scmp.lt.s32.totalorder %s1986_s15, 3  ;;  %s3191_s0 = sld [smem:[#allocation12_spill]] }
  0x37   : > { %p3192_p6 = scmp.ge.s32.totalorder %s1986_s15, 1  ;;  %s148_s4 = scalar_lea.vmem [#allocation2], %s2093_s27 }
  0x38   : > { %s155_s6 = sshll.u32 %s148_s4, 4  ;;  %s145_s5 = scalar_lea.sflag [#allocation3], %s144_s25  ;;  %s2156_s6 = int_to_ptr.vmem [resolvable:$true] %s155_s6 }
  0x39   : > { %p2151_p11 = pnand %p3192_p6, %p205_p9 }
  0x3b   : > { %s3193_s29 = scalar_select %p2151_p11, 1, 0 }
  0x3c   : > { %s2147_s30 = scalar_lea.hbm %s3191_s0, %s2089_s26  ;;  %s1859_s20 = scalar_lea.hbm %s3191_s0, 2048 }
  0x3d   : > { %s1854_s7 = scalar_lea.hbm %s2147_s30, 1024  ;;  %p1860_p5 = scmp.lt.s32.totalorder %s2147_s30, %s3191_s0 }
  0x3e   : > { %p1855_p12 = scmp.ne.s32.totalorder %s2147_s30, %s1854_s7  ;;  %p1861_p7 = scmp.lt.s32.totalorder %s1859_s20, %s1854_s7 }
  0x40   : > { %p1857_p0 = pnand %p1855_p12, %p2116_p2  ;;  %p1862_p8 = por %p1861_p7, %p1860_p5 }
  0x42   : > { %p1858_p4 = pneg %p1857_p0 }
  0x44   : > { %p1863_p10 = pnand %p1862_p8, %p1858_p4 }
  0x46   : > { %1866 = shalt.err (!%p1863_p10)
}
  0x47   : > { %s1867_s25 = scalar_lea.vmem %s2156_s6, 1024  ;;  %s1999_s4 = smov [#allocation2]  }
  0x48   : > { %p1868_p1 = scmp.ne.s32.totalorder %s2156_s6, %s1867_s25  ;;  %s1872_s11 = sshll.u32 %s1999_s4, 4  ;;  %s1873_s11 = int_to_ptr.vmem [resolvable:$false] %s1872_s11 }
  0x49   : > { %s1874_s19 = scalar_lea.vmem %s1873_s11, 2048  ;;  %p1875_p6 = scmp.lt.s32.totalorder %s2156_s6, %s1873_s11 }
  0x4a   : > { %p1870_p3 = pnand %p1868_p1, %p2116_p2  ;;  %p1876_p12 = scmp.lt.s32.totalorder %s1874_s19, %s1867_s25 }
  0x4c   : > { %p1871_p9 = pneg %p1870_p3  ;;  %p1877_p0 = por %p1876_p12, %p1875_p6 }
  0x4e   : > { %p1878_p11 = pnand %p1877_p0, %p1871_p9 }
  0x50   : > { %1881 = shalt.err (!%p1878_p11)
}
  0x51   : > { %s3194_s9 = smov 8   ;;  %s3195_s17 = smov 128  }
  0x52   : > { %1696 = dma.hbm_to_vmem [thread:$0]  (!%p2095_p13), %s2147_s30, 1024, %s2156_s6, %s145_s5, %s3195_s17, %s3195_s17, %s3194_s9  }
  0x53   : > { %s2187_s4 = scalar_lea.hbm %s3175_s2, %s2089_s26  ;;  %s190_s25 = scalar_lea.vmem [#allocation7], %s2093_s27 }
  0x54   : > { %s197_s11 = sshll.u32 %s190_s25, 4  ;;  %s1882_s19 = scalar_lea.hbm %s2187_s4, 1024  ;;  %s198_s11 = int_to_ptr.vmem [resolvable:$true] %s197_s11 }
  0x55   : > { %p1883_p11 = scmp.ne.s32.totalorder %s2187_s4, %s1882_s19  ;;  %s1887_s30 = scalar_lea.hbm %s3175_s2, 2048 }
  0x56   : > { %p1888_p7 = scmp.lt.s32.totalorder %s2187_s4, %s3175_s2  ;;  %p1889_p8 = scmp.lt.s32.totalorder %s1887_s30, %s1882_s19 }
  0x57   : > { %p1885_p4 = pnand %p1883_p11, %p2116_p2 }
  0x58   : > { %p1890_p10 = por %p1889_p8, %p1888_p7 }
  0x59   : > { %p1886_p5 = pneg %p1885_p4 }
  0x5b   : > { %p1891_p1 = pnand %p1890_p10, %p1886_p5 }
  0x5d   : > { %1894 = shalt.err (!%p1891_p1)
}
  0x5e   : > { %s1895_s26 = scalar_lea.vmem %s198_s11, 1024  ;;  %s2000_s27 = smov [#allocation7]  }
  0x5f   : > { %p1896_p3 = scmp.ne.s32.totalorder %s198_s11, %s1895_s26  ;;  %s1900_s7 = sshll.u32 %s2000_s27, 4  ;;  %s1901_s7 = int_to_ptr.vmem [resolvable:$false] %s1900_s7 }
  0x60   : > { %s1902_s20 = scalar_lea.vmem %s1901_s7, 2048  ;;  %p1903_p12 = scmp.lt.s32.totalorder %s198_s11, %s1901_s7 }
  0x61   : > { %p1898_p9 = pnand %p1896_p3, %p2116_p2  ;;  %p1904_p0 = scmp.lt.s32.totalorder %s1902_s20, %s1895_s26 }
  0x63   : > { %p1899_p6 = pneg %p1898_p9  ;;  %p1905_p11 = por %p1904_p0, %p1903_p12 }
  0x65   : > { %p1906_p4 = pnand %p1905_p11, %p1899_p6 }
  0x67   : > { %1909 = shalt.err (!%p1906_p4)
}
  0x68   : > { %1702 = dma.hbm_to_vmem [thread:$0]  (!%p2095_p13), %s2187_s4, 1024, %s198_s11, %s2110_s8, %s3195_s17, %s3195_s17, %s3194_s9  }
  0x69   : > { %p3196_p2 = scmp.ne.s32.totalorder %s3193_s29, 0 }
  0x6a   : > { %s2213_s0 = sand.u32 (!%p3196_p2), 1, %s1978_s13   ;;  %p3197_p5 = scmp.ne.s32.totalorder (!%p3196_p2), %s3185_s22, 0 }
  0x6b   : > { %209 = sbr.rel (%p3196_p2) target bundleno = 619 (0x26b), region = 32  ;;  %s2216_s1 = sshll.u32 (!%p3196_p2), %s2213_s0, 6 }
  0x6c   : > { %s212_s10 = scalar_lea.sflag (!%p3196_p2), [#allocation3], %s2213_s0  ;;  %s215_s28 = scalar_lea.vmem (!%p3196_p2), [#allocation2], %s2216_s1 }
  0x70   : > { %1961 = dma.done.wait (%p3197_p5), %s212_s10, 1024  }
  0x71   : > { %1963 = vsyncadd (%p3197_p5), %s212_s10, 4294966272  ;;  %s220_s8 = sand.u32 1, %s2054_s16   ;;  %s224_s9 = scalar_lea.vmem [#allocation5], %s2216_s1  ;;  %v269_v0 = vlaneseq }
  0x72   : > { %s221_s29 = scalar_lea.sflag [#allocation6], %s220_s8  ;;  %s1611_s17 = sshll.u32 %s2213_s0, 3 }
  0x73   : > { %1965 = dma.done.wait (%p3197_p5), %s221_s29, 2048  }
  0x74   : > { %1967 = vsyncadd (%p3197_p5), %s221_s29, 4294965248  ;;  %v270_v1 = vand.u32 127, %v269_v0  ;;  %s2001_s4 = smov 1   ;;  %s233_s25 = scalar_lea.vmem [#allocation7], %s2216_s1  ;;  %v2240_v6 = vmov 0.0  }
  0x75   : > { %s2238_s11 = scalar_lea.vmem [#allocation8], %s1611_s17  ;;  %s2242_s22 = smov 0  }
  0x76   : > { %v271_v2 = vcvt.s32.f32 %v270_v1  ;;  %vm272_vm0 = vcmp.eq.s32.totalorder %v270_v1, 0 }
  0x78   : > { %275 = vrot.lane.b32.xlu0 %v271_v2, %s2001_s4  ;;  %v1612_v3 = vadd.f32 -1.0, %v271_v2 }
  0x7a   : > { %v2231_v4 = vsel %vm272_vm0, 127.0, %v1612_v3 }
  0xea   : > { %v2233_v5 = vpop.permute.xlu0 %275 }
  0xeb   : > { %vm277_vm1 = vcmp.eq.f32.partialorder %v2233_v5, %v2231_v4 }
  0xec LB: >> { %s2251_s19 = sshll.u32 %s1994_s22, 5  ;;  %v2002_v49 = vmov 683565275   ;;  %v2003_v51 = vmov 2475754826   ;;  %s2008_s5 = smov 127   ;;  %s1994_s22 = sphi %s2242_s22, %s283_s22   ;;  %v1990_v6 = vphi %v2240_v6, %v3214_v6  }
  0xed   : >> { %s286_s30 = scalar_lea.vmem %s215_s28, %s2251_s19 [#allocation2]  ;;  %s291_s6 = scalar_lea.vmem %s224_s9, %s2251_s19 [#allocation5]  ;;  %v2004_v53 = vmov 2131351028   ;;  %v2005_v55 = vmov 2102212464   ;;  %v2006_v57 = vmov 920167782  }
  0xee   : >> { %v2259_v7 = vld [vmem:[%s286_s30] sm:$0xff]  ;;  %v2263_v9 = vld [vmem:[%s286_s30 + $0x8] sm:$0xff]  ;;  %v2269_v12 = vld [vmem:[%s286_s30 + $0x10] sm:$0xff]  ;;  %v2007_v1 = vmov 1326507024   ;;  %s2009_s26 = smov 1   ;;  %s3089_s27 = scalar_lea.vmem %s233_s25, %s2251_s19 [#allocation7] }
  0xef   : >> { %v2261_v8 = vld [vmem:[%s291_s6] sm:$0xff]  ;;  %v2267_v11 = vld [vmem:[%s291_s6 + $0x8] sm:$0xff]  ;;  %v2271_v13 = vld [vmem:[%s291_s6 + $0x10] sm:$0xff]  ;;  %s283_s22 = sadd.s32 1, %s1994_s22  }
  0xf0   : >> { %v301_v10 = vsub.f32 %v2259_v7, %v2261_v8  ;;  %v302_v14 = vsub.f32 %v2263_v9, %v2267_v11  ;;  %v303_v15 = vsub.f32 %v2269_v12, %v2271_v13  ;;  %v2292_v32 = vld [vmem:[%s286_s30 + $0x18] sm:$0xff]  ;;  %p280_p13 = scmp.ge.s32.totalorder %s283_s22, 2  }
  0xf1   : >> { %v2294_v33 = vld [vmem:[%s291_s6 + $0x18] sm:$0xff]  ;;  %s1647_s7 = sshll.u32 (%p280_p13), %s2054_s16, 7  ;;  %s1468_s29 = sshll.u32 (%p280_p13), %s2238_s11, 4  ;;  %s1469_s29 = int_to_ptr.vmem [resolvable:$true] %s1468_s29 }
  0xf2   : >> { %v2277_v16 = vmul.f32 0.008726646, %v301_v10  ;;  %v2279_v17 = vmul.f32 0.008726646, %v302_v14  ;;  %v2281_v18 = vmul.f32 0.008726646, %v303_v15  ;;  %v304_v39 = vsub.f32 %v2292_v32, %v2294_v33  ;;  %s1466_s8 = scalar_lea.hbm (%p280_p13), %s3176_s3, %s1647_s7 }
  0xf3   : > { %s1455_s17 = scalar_lea.sflag (%p280_p13), [#allocation4], %s2213_s0  ;;  %s1910_s4 = scalar_lea.vmem (%p280_p13), %s1469_s29, 128 }
  0xf4   : >> { %v309_v19 = vand.u32 2147483647, %v2277_v16  ;;  %v312_v20 = vand.u32 2139095040, %v2277_v16  ;;  %v413_v21 = vand.u32 2147483647, %v2279_v17  ;;  %v416_v22 = vand.u32 2139095040, %v2279_v17  ;;  %p1911_p7 = scmp.ne.s32.totalorder (%p280_p13), %s1469_s29, %s1910_s4 }
  0xf5   : >> { %v520_v27 = vand.u32 2139095040, %v2281_v18  ;;  %v517_v43 = vand.u32 2147483647, %v2281_v18  ;;  %vm311_vm15 = vcmp.lt.s32.totalorder %v2277_v16, 0  ;;  %p3215_p8 = scmp.ne.s32.totalorder (%p280_p13), %s3186_s23, 0  ;;  %s2012_s22 = smov (%p280_p13), [#allocation8]  }
  0xf6   : >> { %v313_v23 = vshrl.u32 %v312_v20, 23  ;;  %v316_v24 = vand.u32 8388607, %v309_v19  ;;  %v417_v25 = vshrl.u32 %v416_v22, 23  ;;  %v420_v26 = vand.u32 8388607, %v413_v21 }
  0xf7   : >> { %v521_v30 = vshrl.u32 %v520_v27, 23  ;;  %p1912_p10 = pnand (%p280_p13), %p1911_p7, %p3215_p8  ;;  %s1914_s1 = sshll.u32 (%p280_p13), %s2012_s22, 4  ;;  %s1915_s1 = int_to_ptr.vmem [resolvable:$false] %s1914_s1 }
  0xf8   : >> { %v1614_v28 = vadd.s32 4294967169, %v313_v23  ;;  %v1618_v29 = vadd.s32 4294967169, %v417_v25  ;;  %v317_v34 = vor.u32 8388608, %v316_v24  ;;  %v421_v35 = vor.u32 8388608, %v420_v26  ;;  %s1916_s28 = scalar_lea.vmem (%p280_p13), %s1915_s1, 256  ;;  %p1917_p3 = scmp.lt.s32.totalorder (%p280_p13), %s1469_s29, %s1915_s1 }
  0xf9   : >> { %v1622_v37 = vadd.s32 4294967169, %v521_v30  ;;  %p1913_p1 = pneg (%p280_p13), %p1912_p10  ;;  %p1918_p9 = scmp.lt.s32.totalorder (%p280_p13), %s1916_s28, %s1910_s4 }
  0xfa   : >> { %v319_v31 = vadd.s32 1, %v1614_v28  ;;  %v423_v36 = vadd.s32 1, %v1618_v29  ;;  %v2299_v44 = vshll.u32 %v317_v34, 8  ;;  %v2301_v46 = vshll.u32 %v421_v35, 8 }
  0xfb   : >> { %v2303_v47 = vadd.s32 1, %v1622_v37  ;;  %p1919_p6 = por (%p280_p13), %p1918_p9, %p1917_p3 }
  0xfc   : >> { %vm320_vm2 = vcmp.gt.s32.totalorder %v319_v31, 0  ;;  %vm424_vm3 = vcmp.gt.s32.totalorder %v423_v36, 0 }
  0xfd   : >> { %v321_v38 = vsel %vm320_vm2, %v319_v31, 0  ;;  %v425_v42 = vsel %vm424_vm3, %v423_v36, 0  ;;  %vm528_vm8 = vcmp.gt.s32.totalorder %v2303_v47, 0  ;;  %vm2410_vm2 = vcmp.le.f32.partialorder %v309_v19, 0.7853982  ;;  %p1920_p12 = pnand (%p280_p13), %p1919_p6, %p1913_p1 }
  0xfe   : >> { %v322_v40 = vshrl.u32 %v321_v38, 5  ;;  %v323_v41 = vand.u32 31, %v321_v38  ;;  %v427_v45 = vand.u32 31, %v425_v42  ;;  %v2310_v59 = vshrl.u32 %v425_v42, 5 }
 0x100   : >> { %v324_v48 = vsub.s32 32, %v323_v41  ;;  %v326_v50 = vshll.u32 %v2002_v49, %v323_v41  ;;  %v329_v52 = vshll.u32 %v2003_v51, %v323_v41  ;;  %v332_v54 = vshll.u32 %v2004_v53, %v323_v41 }
 0x101   : >> { %v335_v56 = vshll.u32 %v2005_v55, %v323_v41  ;;  %v338_v58 = vshll.u32 %v2006_v57, %v323_v41  ;;  %vm341_vm4 = vcmp.lt.s32.totalorder %v322_v40, 1  ;;  %vm342_vm5 = vcmp.lt.s32.totalorder %v322_v40, 2 }
 0x102   : >> { %v325_v60 = vshrl.u32 %v2002_v49, %v324_v48  ;;  %v327_v61 = vshrl.u32 %v2003_v51, %v324_v48  ;;  %v330_v62 = vshrl.u32 %v2004_v53, %v324_v48  ;;  %v333_v63 = vshrl.u32 %v2005_v55, %v324_v48 }
 0x103   : >> { %v336_v0 = vshrl.u32 %v2006_v57, %v324_v48  ;;  %v339_v2 = vshrl.u32 %v2007_v1, %v324_v48  ;;  %vm344_vm6 = vcmp.lt.s32.totalorder %v322_v40, 4  ;;  %v428_v15 = vsub.s32 32, %v427_v45 }
 0x104   : >> { %v328_v3 = vor.u32 %v327_v61, %v326_v50  ;;  %v331_v10 = vor.u32 %v330_v62, %v329_v52  ;;  %v334_v14 = vor.u32 %v333_v63, %v332_v54  ;;  %vm343_vm7 = vcmp.lt.s32.totalorder %v322_v40, 3 }
 0x105   : >> { %v337_v20 = vor.u32 %v336_v0, %v335_v56  ;;  %v340_v22 = vor.u32 %v339_v2, %v338_v58  ;;  %v430_v23 = vshll.u32 %v2002_v49, %v427_v45  ;;  %v433_v31 = vshll.u32 %v2003_v51, %v427_v45 }
 0x106   : >> { %v345_v24 = vsel %vm341_vm4, %v325_v60, %v328_v3  ;;  %v346_v25 = vsel %vm344_vm6, %v334_v14, 2102212464  ;;  %v349_v26 = vsel %vm341_vm4, %v328_v3, %v331_v10  ;;  %v353_v27 = vsel %vm341_vm4, %v331_v10, %v334_v14 }
 0x107   : >> { %v347_v28 = vsel %vm343_vm7, %v331_v10, %v346_v25  ;;  %v350_v29 = vsel %vm344_vm6, %v337_v20, 920167782  ;;  %v354_v30 = vsel %vm344_vm6, %v340_v22, 1326507024  ;;  %v429_v36 = vshrl.u32 %v2002_v49, %v428_v15 }
 0x108   : >> { %v351_v34 = vsel %vm343_vm7, %v334_v14, %v350_v29  ;;  %v355_v35 = vsel %vm343_vm7, %v337_v20, %v354_v30  ;;  %v431_v37 = vshrl.u32 %v2003_v51, %v428_v15  ;;  %v348_v38 = vsel %vm342_vm5, %v345_v24, %v347_v28 }
 0x109   : >> { %v352_v41 = vsel %vm342_vm5, %v349_v26, %v351_v34  ;;  %v356_v42 = vsel %vm342_vm5, %v353_v27, %v355_v35  ;;  %v434_v48 = vshrl.u32 %v2004_v53, %v428_v15  ;;  %v436_v61 = vshll.u32 %v2004_v53, %v427_v45 }
 0x10a   : >> { %v2331_v50 = vmul.u32.u64.low %v2299_v44, %v356_v42  ;;  %v2332_v52 = vmul.u32.u64.high %v2299_v44, %v356_v42, %v2331_v50  ;;  %v2335_v54 = vmul.u32.u64.low %v2299_v44, %v352_v41  ;;  %v2336_v56 = vmul.u32.u64.high %v2299_v44, %v352_v41, %v2335_v54 }
 0x10b   : >> { %v432_v58 = vor.u32 %v431_v37, %v430_v23  ;;  %v435_v60 = vor.u32 %v434_v48, %v433_v31  ;;  %v437_v62 = vshrl.u32 %v2005_v55, %v428_v15  ;;  %v439_v40 = vshll.u32 %v2005_v55, %v427_v45 }
 0x10c   : >> { %v440_v63 = vshrl.u32 %v2006_v57, %v428_v15  ;;  %v442_v0 = vshll.u32 %v2006_v57, %v427_v45  ;;  %v443_v2 = vshrl.u32 %v2007_v1, %v428_v15  ;;  %v364_v3 = vmul.u32 %v2299_v44, %v348_v38 }
 0x10d   : >> { %v438_v10 = vor.u32 %v437_v62, %v436_v61  ;;  %vm445_vm9 = vcmp.lt.s32.totalorder %v2310_v59, 1  ;;  %vm446_vm10 = vcmp.lt.s32.totalorder %v2310_v59, 2  ;;  %vm366_vm11 = vc.u32 %v2332_v52, %v2335_v54 }
 0x10e   : >> { %v367_v14 = vadd.s32 1, %v2336_v56  ;;  %v441_v20 = vor.u32 %v440_v63, %v439_v40  ;;  %vm447_vm12 = vcmp.lt.s32.totalorder %v2310_v59, 3  ;;  %v444_v22 = vor.u32 %v443_v2, %v442_v0 }
 0x10f   : >> { %vm448_vm13 = vcmp.lt.s32.totalorder %v2310_v59, 4  ;;  %v449_v45 = vsel %vm445_vm9, %v429_v36, %v432_v58  ;;  %v453_v15 = vsel %vm445_vm9, %v432_v58, %v435_v60  ;;  %v457_v25 = vsel %vm445_vm9, %v435_v60, %v438_v10 }
 0x110   : >> { %v368_v44 = vsel %vm366_vm11, %v367_v14, %v2336_v56  ;;  %v450_v23 = vsel %vm448_vm13, %v438_v10, 2102212464  ;;  %v454_v24 = vsel %vm448_vm13, %v441_v20, 920167782  ;;  %v458_v29 = vsel %vm448_vm13, %v444_v22, 1326507024 }
 0x111   : >> { %v369_v26 = vadd.s32 %v368_v44, %v364_v3  ;;  %v451_v27 = vsel %vm447_vm12, %v435_v60, %v450_v23  ;;  %v455_v28 = vsel %vm447_vm12, %v438_v10, %v454_v24  ;;  %v459_v34 = vsel %vm447_vm12, %v441_v20, %v458_v29 }
 0x112   : >> { %v452_v30 = vsel %vm446_vm10, %v449_v45, %v451_v27  ;;  %v456_v31 = vsel %vm446_vm10, %v453_v15, %v455_v28  ;;  %v529_v35 = vsel %vm528_vm8, %v2303_v47, 0  ;;  %v460_v37 = vsel %vm446_vm10, %v457_v25, %v459_v34 }
 0x113   : >> { %v370_v36 = vadd.s32 536870912, %v369_v26  ;;  %v2364_v38 = vmul.u32.u64.low %v2301_v46, %v456_v31  ;;  %v2365_v41 = vmul.u32.u64.high %v2301_v46, %v456_v31, %v2364_v38  ;;  %v524_v50 = vand.u32 8388607, %v517_v43 }
 0x114   : >> { %v2369_v42 = vmul.u32.u64.low %v2301_v46, %v460_v37  ;;  %v2370_v48 = vmul.u32.u64.high %v2301_v46, %v460_v37, %v2369_v42  ;;  %v2377_v47 = vmul.f32 0.008726646, %v304_v39  ;;  %v531_v59 = vand.u32 31, %v529_v35 }
 0x115   : >> { %v371_v56 = vshrl.u32 %v370_v36, 30  ;;  %v468_v58 = vmul.u32 %v2301_v46, %v452_v30  ;;  %v471_v61 = vadd.s32 1, %v2365_v41  ;;  %v525_v40 = vor.u32 8388608, %v524_v50 }
 0x116   : >> { %v532_v62 = vsub.s32 32, %v531_v59  ;;  %vm470_vm14 = vc.u32 %v2370_v48, %v2364_v38  ;;  %v624_v63 = vand.u32 2139095040, %v2377_v47  ;;  %v2388_v2 = vshrl.u32 %v529_v35, 5 }
 0x117   : >> { %v372_v60 = vshll.u32 %v371_v56, 30  ;;  %v472_v39 = vsel %vm470_vm14, %v471_v61, %v2365_v41  ;;  %v534_v46 = vshll.u32 %v2002_v49, %v531_v59  ;;  %v537_v14 = vshll.u32 %v2003_v51, %v531_v59 }
 0x118   : >> { %v473_v3 = vadd.s32 %v472_v39, %v468_v58  ;;  %v535_v10 = vshrl.u32 %v2003_v51, %v532_v62  ;;  %v538_v22 = vshrl.u32 %v2004_v53, %v532_v62  ;;  %v540_v45 = vshll.u32 %v2004_v53, %v531_v59 }
 0x119   : >> { %v2385_v0 = vsub.s32 %v369_v26, %v372_v60  ;;  %v541_v15 = vshrl.u32 %v2005_v55, %v532_v62  ;;  %v543_v23 = vshll.u32 %v2005_v55, %v531_v59  ;;  %v2398_v24 = vshll.u32 %v525_v40, 8 }
 0x11a   : >> { %v474_v44 = vadd.s32 536870912, %v473_v3  ;;  %v625_v25 = vshrl.u32 %v624_v63, 23  ;;  %v395_v27 = vsub.s32 4, %v371_v56  ;;  %v544_v28 = vshrl.u32 %v2006_v57, %v532_v62 }
 0x11b   : >> { %v375_v20 = vsub.s32 0, %v2385_v0  ;;  %vm552_vm0 = vcmp.lt.s32.totalorder %v2388_v2, 4  ;;  %v533_v30 = vshrl.u32 %v2002_v49, %v532_v62  ;;  %v546_v31 = vshll.u32 %v2006_v57, %v531_v59 }
 0x11c   : >> { %v2403_v29 = vshrl.u32 %v474_v44, 30  ;;  %v547_v34 = vshrl.u32 %v2007_v1, %v532_v62  ;;  %v536_v37 = vor.u32 %v535_v10, %v534_v46  ;;  %v539_v41 = vor.u32 %v538_v22, %v537_v14 }
 0x11d   : >> { %v1615_v26 = vmin.u32 %v375_v20, %v2385_v0  ;;  %v542_v42 = vor.u32 %v541_v15, %v540_v45  ;;  %v365_v50 = vadd.s32 %v2335_v54, %v2332_v52  ;;  %v545_v60 = vor.u32 %v544_v28, %v543_v23 }
 0x11e   : >> { %v476_v58 = vshll.u32 %v2403_v29, 30  ;;  %vm549_vm3 = vcmp.lt.s32.totalorder %v2388_v2, 1  ;;  %v548_v61 = vor.u32 %v547_v34, %v546_v31  ;;  %vm551_vm4 = vcmp.lt.s32.totalorder %v2388_v2, 3 }
 0x11f   : >> { %v377_v36 = vclz %v1615_v26  ;;  %v554_v19 = vsel %vm552_vm0, %v542_v42, 2102212464  ;;  %v396_v62 = vsel %vm311_vm15, %v395_v27, %v371_v56  ;;  %vm550_vm5 = vcmp.lt.s32.totalorder %v2388_v2, 2 }
 0x120   : >> { %v2423_v40 = vsub.s32 %v473_v3, %v476_v58  ;;  %v558_v52 = vsel %vm552_vm0, %v545_v60, 920167782  ;;  %v553_v54 = vsel %vm549_vm3, %v533_v30, %v536_v37  ;;  %v557_v63 = vsel %vm549_vm3, %v536_v37, %v539_v41 }
 0x121   : >> { %v1616_v59 = vadd.s32 4294967294, %v377_v36  ;;  %v561_v39 = vsel %vm549_vm3, %v539_v41, %v542_v42  ;;  %v555_v14 = vsel %vm551_vm4, %v539_v41, %v554_v19  ;;  %v559_v56 = vsel %vm551_vm4, %v542_v42, %v558_v52 }
 0x122   : >> { %v479_v10 = vsub.s32 0, %v2423_v40  ;;  %v562_v45 = vsel %vm552_vm0, %v548_v61, 1326507024  ;;  %v621_v23 = vand.u32 2147483647, %v2377_v47  ;;  %v1626_v26 = vadd.s32 4294967169, %v625_v25 }
 0x123   : >> { %vm1617_vm6 = vcmp.lt.s32.totalorder %v1616_v59, 0  ;;  %v563_v44 = vsel %vm551_vm4, %v545_v60, %v562_v45  ;;  %v560_v30 = vsel %vm550_vm5, %v557_v63, %v559_v56  ;;  %v398_v31 = vsel %vm2410_vm2, 0, %v396_v62 }
 0x124   : >> { %v380_v46 = vsel %vm1617_vm6, 0, %v1616_v59  ;;  %v1619_v15 = vmin.u32 %v479_v10, %v2423_v40  ;;  %v469_v34 = vadd.s32 %v2364_v38, %v2370_v48  ;;  %v556_v37 = vsel %vm550_vm5, %v553_v54, %v555_v14 }
 0x125   : >> { %v381_v3 = vsub.s32 32, %v380_v46  ;;  %v382_v20 = vshll.u32 %v2385_v0, %v380_v46  ;;  %v385_v22 = vsub.s32 4294967266, %v380_v46  ;;  %v564_v0 = vsel %vm550_vm5, %v561_v39, %v563_v44 }
 0x126   : >> { %v481_v36 = vclz %v1619_v15  ;;  %v2455_v60 = vmul.u32.u64.low %v2398_v24, %v560_v30  ;;  %v2456_v59 = vmul.u32.u64.high %v2398_v24, %v560_v30, %v2455_v60  ;;  %v631_v61 = vadd.s32 1, %v1626_v26 }
 0x127   : >> { %v383_v27 = vshrl.u32 %v365_v50, %v381_v3  ;;  %v386_v28 = vadd.s32 127, %v385_v22  ;;  %v2451_v42 = vmul.u32.u64.low %v2398_v24, %v564_v0  ;;  %v2452_v50 = vmul.u32.u64.high %v2398_v24, %v564_v0, %v2451_v42 }
 0x128   : >> { %v1620_v58 = vadd.s32 4294967294, %v481_v36  ;;  %v402_v38 = vadd.s32 3, %v398_v31  ;;  %v499_v48 = vsub.s32 4, %v2403_v29  ;;  %vm632_vm8 = vcmp.gt.s32.totalorder %v631_v61, 0 }
 0x129   : >> { %v384_v41 = vor.u32 %v383_v27, %v382_v20  ;;  %v387_v25 = vshll.u32 %v386_v28, 23  ;;  %v2462_v2 = vadd.f32 %v2261_v8, %v2259_v7  ;;  %v2466_v52 = vadd.f32 %v2267_v11, %v2263_v9 }
 0x12a   : >> { %vm1621_vm7 = vcmp.lt.s32.totalorder %v1620_v58, 0  ;;  %v572_v39 = vmul.u32 %v2398_v24, %v556_v37  ;;  %vm574_vm9 = vc.u32 %v2452_v50, %v2455_v60  ;;  %v575_v56 = vadd.s32 1, %v2456_v59 }
 0x12b   : >> { %v388_v19 = vor.u32 4788187, %v387_v25  ;;  %v391_v62 = vcvt.s32.f32 %v384_v41  ;;  %v484_v63 = vsel %vm1621_vm7, 0, %v1620_v58  ;;  %v633_v7 = vsel %vm632_vm8, %v631_v61, 0 }
 0x12c   : >> { %v485_v46 = vsub.s32 32, %v484_v63  ;;  %v486_v10 = vshll.u32 %v2423_v40, %v484_v63  ;;  %v489_v14 = vsub.s32 4294967266, %v484_v63  ;;  %v2475_v8 = vadd.f32 %v2271_v13, %v2269_v12 }
 0x12d   : >> { %v389_v54 = vand.u32 2147483647, %v388_v19  ;;  %v2479_v9 = vadd.f32 %v2294_v33, %v2292_v32  ;;  %vm415_vm10 = vcmp.lt.s32.totalorder %v2279_v17, 0  ;;  %v576_v20 = vsel %vm574_vm9, %v575_v56, %v2456_v59 }
 0x12e   : >> { %v487_v11 = vshrl.u32 %v469_v34, %v485_v46  ;;  %v490_v24 = vadd.s32 127, %v489_v14  ;;  %vm2485_vm11 = vcmp.le.f32.partialorder %v413_v21, 0.7853982  ;;  %v577_v45 = vadd.s32 %v576_v20, %v572_v39 }
 0x12f   : >> { %v392_v3 = vmul.f32 %v391_v62, %v389_v54  ;;  %v635_v12 = vand.u32 31, %v633_v7  ;;  %v2489_v13 = vand.u32 3, %v402_v38  ;;  %v628_v33 = vand.u32 8388607, %v621_v23 }
 0x130   : >> { %v488_v15 = vor.u32 %v487_v11, %v486_v10  ;;  %v491_v32 = vshll.u32 %v490_v24, 23  ;;  %v500_v26 = vsel %vm415_vm10, %v499_v48, %v2403_v29  ;;  %v578_v21 = vadd.s32 536870912, %v577_v45 }
 0x131   : >> { %v393_v40 = vxor.u32 2147483648, %v392_v3  ;;  %v636_v27 = vsub.s32 32, %v635_v12  ;;  %v638_v31 = vshll.u32 %v2002_v49, %v635_v12  ;;  %v641_v37 = vshll.u32 %v2003_v51, %v635_v12 }
 0x132   : >> { %v492_v30 = vor.u32 4788187, %v491_v32  ;;  %v495_v0 = vcvt.s32.f32 %v488_v15  ;;  %v2502_v34 = vshrl.u32 %v578_v21, 30  ;;  %v644_v25 = vshll.u32 %v2004_v53, %v635_v12 }
 0x133   : >> { %v394_v44 = vsel %vm311_vm15, %v393_v40, %v392_v3  ;;  %v639_v36 = vshrl.u32 %v2003_v51, %v636_v27  ;;  %v642_v29 = vshrl.u32 %v2004_v53, %v636_v27  ;;  %v502_v35 = vsel %vm2485_vm11, 0, %v500_v26 }
 0x134   : >> { %v397_v28 = vsel %vm2410_vm2, %v2277_v16, %v394_v44  ;;  %v493_v41 = vand.u32 2147483647, %v492_v30  ;;  %v580_v42 = vshll.u32 %v2502_v34, 30  ;;  %v634_v58 = vshrl.u32 %v633_v7, 5 }
 0x135   : >> { %1770 = vcosq.f32 %v397_v28  ;;  %v645_v59 = vshrl.u32 %v2005_v55, %v636_v27  ;;  %v629_v19 = vor.u32 8388608, %v628_v33  ;;  %v647_v62 = vshll.u32 %v2005_v55, %v635_v12 }
 0x136   : >> { %1772 = vsinq.f32 %v397_v28  ;;  %v496_v61 = vmul.f32 %v495_v0, %v493_v41  ;;  %v648_v38 = vshrl.u32 %v2006_v57, %v636_v27  ;;  %v2514_v48 = vsub.s32 %v577_v45, %v580_v42 }
 0x137   : >> { %v640_v54 = vor.u32 %v639_v36, %v638_v31  ;;  %v643_v63 = vor.u32 %v642_v29, %v641_v37  ;;  %v650_v39 = vshll.u32 %v2006_v57, %v635_v12  ;;  %vm408_vm12 = vcmp.eq.s32.totalorder %v2489_v13, 2 }
 0x138   : >> { %v497_v46 = vxor.u32 2147483648, %v496_v61  ;;  %v646_v10 = vor.u32 %v645_v59, %v644_v25  ;;  %v649_v14 = vor.u32 %v648_v38, %v647_v62  ;;  %v651_v56 = vshrl.u32 %v2007_v1, %v636_v27 }
 0x139   : >> { %vm405_vm13 = vcmp.eq.s32.totalorder %v2489_v13, 0  ;;  %v583_v3 = vsub.s32 0, %v2514_v48  ;;  %v637_v7 = vshrl.u32 %v2002_v49, %v636_v27  ;;  %vm653_vm14 = vcmp.lt.s32.totalorder %v634_v58, 1 }
 0x13a   : >> { %vm656_vm15 = vcmp.lt.s32.totalorder %v634_v58, 4  ;;  %vm404_vm0 = vcmp.lt.s32.totalorder %v2489_v13, 2  ;;  %v498_v11 = vsel %vm415_vm10, %v497_v46, %v496_v61  ;;  %v506_v24 = vadd.s32 3, %v502_v35 }
 0x13b   : >> { %v652_v20 = vor.u32 %v651_v56, %v650_v39  ;;  %v658_v40 = vsel %vm656_vm15, %v646_v10, 2102212464  ;;  %vm401_vm2 = vweird.f32 %v2277_v16  ;;  %v501_v45 = vsel %vm2485_vm11, %v2279_v17, %v498_v11 }
 0x13c   : >> { %v1623_v12 = vmin.u32 %v583_v3, %v2514_v48  ;;  %vm655_vm3 = vcmp.lt.s32.totalorder %v634_v58, 3  ;;  %v669_v15 = vshll.u32 %v629_v19, 8  ;;  %1774 = vcosq.f32 %v501_v45 }
 0x13d   : >> { %vm654_vm4 = vcmp.lt.s32.totalorder %v634_v58, 2  ;;  %v661_v32 = vsel %vm653_vm14, %v640_v54, %v643_v63  ;;  %v662_v33 = vsel %vm656_vm15, %v649_v14, 920167782  ;;  %1776 = vsinq.f32 %v501_v45 }
 0x13e   : >> { %v585_v44 = vclz %v1623_v12  ;;  %v657_v26 = vsel %vm653_vm14, %v637_v7, %v640_v54  ;;  %v659_v21 = vsel %vm655_vm3, %v643_v63, %v658_v40  ;;  %v573_v22 = vadd.s32 %v2455_v60, %v2452_v50 }
 0x13f   : >> { %v663_v27 = vsel %vm655_vm3, %v646_v10, %v662_v33  ;;  %v665_v28 = vsel %vm653_vm14, %v643_v63, %v646_v10  ;;  %v666_v30 = vsel %vm656_vm15, %v652_v20, 1326507024  ;;  %v2543_v37 = vmul.f32 0.017453292, %v2462_v2 }
 0x140   : >> { %v1624_v0 = vadd.s32 4294967294, %v585_v44  ;;  %v664_v31 = vsel %vm654_vm4, %v661_v32, %v663_v27  ;;  %v667_v36 = vsel %vm655_vm3, %v649_v14, %v666_v30  ;;  %v660_v29 = vsel %vm654_vm4, %v657_v26, %v659_v21 }
 0x141   : >> { %v668_v25 = vsel %vm654_vm4, %v665_v28, %v667_v36  ;;  %v2547_v50 = vmul.u32.u64.low %v669_v15, %v664_v31  ;;  %v2548_v60 = vmul.u32.u64.high %v669_v15, %v664_v31, %v2547_v50  ;;  %v507_v62 = vand.u32 3, %v506_v24 }
 0x142   : >> { %v1771_v41 = vpop.eup %1770  ;;  %vm1625_vm5 = vcmp.lt.s32.totalorder %v1624_v0, 0  ;;  %v2551_v59 = vmul.u32.u64.low %v669_v15, %v668_v25  ;;  %v2552_v61 = vmul.u32.u64.high %v669_v15, %v668_v25, %v2551_v59  ;;  %v603_v2 = vsub.s32 4, %v2502_v34 }
 0x143   : >> { %v1773_v35 = vpop.eup %1772  ;;  %v409_v42 = vxor.u32 2147483648, %v1771_v41  ;;  %v588_v38 = vsel %vm1625_vm5, 0, %v1624_v0  ;;  %v676_v10 = vmul.u32 %v669_v15, %v660_v29  ;;  %v679_v14 = vadd.s32 1, %v2548_v60 }
 0x144   : >> { %v406_v19 = vxor.u32 2147483648, %v1773_v35  ;;  %v589_v58 = vsub.s32 32, %v588_v38  ;;  %v590_v63 = vshll.u32 %v2514_v48, %v588_v38  ;;  %v593_v39 = vsub.s32 4294967266, %v588_v38 }
 0x145   : >> { %v410_v54 = vsel %vm408_vm12, %v409_v42, %v1773_v35  ;;  %v740_v56 = vand.u32 2139095040, %v2543_v37  ;;  %vm519_vm6 = vcmp.lt.s32.totalorder %v2281_v18, 0  ;;  %vm678_vm7 = vc.u32 %v2552_v61, %v2547_v50 }
 0x146   : >> { %v407_v46 = vsel %vm405_vm13, %v1771_v41, %v406_v19  ;;  %v591_v7 = vshrl.u32 %v573_v22, %v589_v58  ;;  %v594_v11 = vadd.s32 127, %v593_v39  ;;  %v604_v48 = vsel %vm519_vm6, %v603_v2, %v2502_v34 }
 0x147   : >> { %v411_v3 = vsel %vm404_vm0, %v407_v46, %v410_v54  ;;  %v741_v20 = vshrl.u32 %v740_v56, 23  ;;  %v680_v12 = vsel %vm678_vm7, %v679_v14, %v2548_v60  ;;  %vm509_vm8 = vcmp.eq.s32.totalorder %v507_v62, 0 }
 0x148   : >> { %v412_v24 = vsel %vm401_vm2, nan, %v411_v3  ;;  %v592_v45 = vor.u32 %v591_v7, %v590_v63  ;;  %v595_v13 = vshll.u32 %v594_v11, 23  ;;  %vm2577_vm9 = vcmp.le.f32.partialorder %v517_v43, 0.7853982 }
 0x149   : >> { %v2572_v40 = vmul.f32 %v412_v24, %v412_v24  ;;  %v681_v15 = vadd.s32 %v680_v12, %v676_v10  ;;  %v1630_v32 = vadd.s32 4294967169, %v741_v20  ;;  %v1775_v34 = vpop.eup %1774  ;;  %vm512_vm10 = vcmp.eq.s32.totalorder %v507_v62, 2 }
 0x14a   : >> { %v596_v33 = vor.u32 4788187, %v595_v13  ;;  %v599_v44 = vcvt.s32.f32 %v592_v45  ;;  %v606_v43 = vsel %vm2577_vm9, 0, %v604_v48  ;;  %v1777_v26 = vpop.eup %1776  ;;  %v513_v21 = vxor.u32 2147483648, %v1775_v34 }
 0x14b   : >> { %1169 = vrot.lane.b32.xlu1 %v2572_v40, %s2008_s5  ;;  %1161 = vrot.lane.b32.xlu0 %v2572_v40, %s2009_s26  ;;  %v682_v22 = vadd.s32 536870912, %v681_v15  ;;  %v737_v27 = vand.u32 2147483647, %v2543_v37  ;;  %v747_v28 = vadd.s32 1, %v1630_v32  ;;  %vm508_vm11 = vcmp.lt.s32.totalorder %v507_v62, 2 }
 0x14c   : >> { %v510_v30 = vxor.u32 2147483648, %v1777_v26  ;;  %v597_v0 = vand.u32 2147483647, %v596_v33  ;;  %vm505_vm12 = vweird.f32 %v2279_v17  ;;  %v514_v31 = vsel %vm512_vm10, %v513_v21, %v1777_v26 }
 0x14d   : >> { %v2589_v36 = vshrl.u32 %v682_v22, 30  ;;  %vm748_vm13 = vcmp.gt.s32.totalorder %v747_v28, 0  ;;  %v610_v25 = vadd.s32 3, %v606_v43  ;;  %v2594_v59 = vmul.f32 0.017453292, %v2466_v52 }
 0x14e   : >> { %v511_v41 = vsel %vm509_vm8, %v1775_v34, %v510_v30  ;;  %v600_v29 = vmul.f32 %v599_v44, %v597_v0  ;;  %v749_v60 = vsel %vm748_vm13, %v747_v28, 0  ;;  %v744_v19 = vand.u32 8388607, %v737_v27 }
 0x14f   : >> { %v515_v35 = vsel %vm508_vm11, %v511_v41, %v514_v31  ;;  %v684_v42 = vshll.u32 %v2589_v36, 30  ;;  %v751_v2 = vand.u32 31, %v749_v60  ;;  %v2604_v63 = vand.u32 3, %v610_v25 }
 0x150   : >> { %v516_v38 = vsel %vm505_vm12, nan, %v515_v35  ;;  %v601_v17 = vxor.u32 2147483648, %v600_v29  ;;  %v2607_v39 = vmul.f32 0.017453292, %v2475_v8  ;;  %v745_v14 = vor.u32 8388608, %v744_v19 }
 0x151   : >> { %v2598_v54 = vmul.f32 %v516_v38, %v516_v38  ;;  %v2600_v58 = vsub.s32 %v681_v15, %v684_v42  ;;  %v752_v52 = vsub.s32 32, %v751_v2  ;;  %v843_v56 = vand.u32 2139095040, %v2594_v59 }
 0x152   : >> { %v602_v62 = vsel %vm519_vm6, %v601_v17, %v600_v29  ;;  %v754_v8 = vshll.u32 %v2002_v49, %v751_v2  ;;  %v757_v7 = vshll.u32 %v2003_v51, %v751_v2  ;;  %v750_v24 = vshrl.u32 %v749_v60, 5 }
 0x153   : >> { %1171 = vrot.lane.b32.xlu1 %v2598_v54, %s2008_s5  ;;  %1163 = vrot.lane.b32.xlu0 %v2598_v54, %s2009_s26  ;;  %v605_v46 = vsel %vm2577_vm9, %v2281_v18, %v602_v62  ;;  %v687_v10 = vsub.s32 0, %v2600_v58  ;;  %v755_v3 = vshrl.u32 %v2003_v51, %v752_v52  ;;  %v758_v48 = vshrl.u32 %v2004_v53, %v752_v52 }
 0x154   : >> { %1778 = vcosq.f32 %v605_v46  ;;  %v677_v20 = vadd.s32 %v2547_v50, %v2552_v61  ;;  %v760_v45 = vshll.u32 %v2004_v53, %v751_v2  ;;  %v761_v13 = vshrl.u32 %v2005_v55, %v752_v52 }
 0x155   : >> { %1780 = vsinq.f32 %v605_v46  ;;  %v1627_v11 = vmin.u32 %v687_v10, %v2600_v58  ;;  %v763_v12 = vshll.u32 %v2005_v55, %v751_v2  ;;  %v753_v15 = vshrl.u32 %v2002_v49, %v752_v52 }
 0x156   : >> { %v2629_v32 = vshll.u32 %v745_v14, 8  ;;  %v844_v34 = vshrl.u32 %v843_v56, 23  ;;  %v756_v33 = vor.u32 %v755_v3, %v754_v8  ;;  %v759_v44 = vor.u32 %v758_v48, %v757_v7 }
 0x157   : >> { %v689_v16 = vclz %v1627_v11  ;;  %v764_v43 = vshrl.u32 %v2006_v57, %v752_v52  ;;  %v766_v26 = vshll.u32 %v2006_v57, %v751_v2  ;;  %vm616_vm14 = vcmp.eq.s32.totalorder %v2604_v63, 2 }
 0x158   : >> { %v762_v61 = vor.u32 %v761_v13, %v760_v45  ;;  %v767_v21 = vshrl.u32 %v2007_v1, %v752_v52  ;;  %vm769_vm15 = vcmp.lt.s32.totalorder %v750_v24, 1  ;;  %vm770_vm0 = vcmp.lt.s32.totalorder %v750_v24, 2 }
 0x159   : >> { %v1628_v50 = vadd.s32 4294967294, %v689_v16  ;;  %v765_v22 = vor.u32 %v764_v43, %v763_v12  ;;  %vm771_vm2 = vcmp.lt.s32.totalorder %v750_v24, 3  ;;  %vm772_vm3 = vcmp.lt.s32.totalorder %v750_v24, 4 }
 0x15a   : >> { %vm612_vm4 = vcmp.lt.s32.totalorder %v2604_v63, 2  ;;  %v768_v28 = vor.u32 %v767_v21, %v766_v26  ;;  %v773_v30 = vsel %vm769_vm15, %v753_v15, %v756_v33  ;;  %v774_v0 = vsel %vm772_vm3, %v762_v61, 2102212464 }
 0x15b   : >> { %vm1629_vm5 = vcmp.lt.s32.totalorder %v1628_v50, 0  ;;  %vm609_vm6 = vweird.f32 %v2281_v18  ;;  %v775_v41 = vsel %vm771_vm2, %v759_v44, %v774_v0  ;;  %v777_v29 = vsel %vm769_vm15, %v756_v33, %v759_v44 }
 0x15c   : >> { %v692_v31 = vsel %vm1629_vm5, 0, %v1628_v50  ;;  %v778_v25 = vsel %vm772_vm3, %v765_v22, 920167782  ;;  %vm623_vm7 = vcmp.lt.s32.totalorder %v2377_v47, 0  ;;  %v781_v19 = vsel %vm769_vm15, %v759_v44, %v762_v61 }
 0x15d   : >> { %v693_v60 = vsub.s32 32, %v692_v31  ;;  %v694_v35 = vshll.u32 %v2600_v58, %v692_v31  ;;  %v697_v42 = vsub.s32 4294967266, %v692_v31  ;;  %v779_v38 = vsel %vm771_vm2, %v762_v61, %v778_v25 }
 0x15e   : >> { %v782_v17 = vsel %vm772_vm3, %v768_v28, 1326507024  ;;  %v840_v2 = vand.u32 2147483647, %v2594_v59  ;;  %v1634_v62 = vadd.s32 4294967169, %v844_v34  ;;  %v780_v10 = vsel %vm770_vm0, %v777_v29, %v779_v38 }
 0x15f   : >> { %v695_v52 = vshrl.u32 %v677_v20, %v693_v60  ;;  %v698_v46 = vadd.s32 127, %v697_v42  ;;  %v783_v14 = vsel %vm771_vm2, %v765_v22, %v782_v17  ;;  %v776_v56 = vsel %vm770_vm0, %v773_v30, %v775_v41 }
 0x160   : >> { %v784_v58 = vsel %vm770_vm0, %v781_v19, %v783_v14  ;;  %v2653_v8 = vmul.u32.u64.low %v2629_v32, %v780_v10  ;;  %v2654_v3 = vmul.u32.u64.high %v2629_v32, %v780_v10, %v2653_v8  ;;  %vm613_vm8 = vcmp.eq.s32.totalorder %v2604_v63, 0 }
 0x161   : >> { %v1779_v7 = vpop.eup %1778  ;;  %v696_v11 = vor.u32 %v695_v52, %v694_v35  ;;  %v699_v48 = vshll.u32 %v698_v46, 23  ;;  %v2658_v45 = vmul.u32.u64.low %v2629_v32, %v784_v58  ;;  %v2659_v20 = vmul.u32.u64.high %v2629_v32, %v784_v58, %v2658_v45 }
 0x162   : >> { %v1781_v13 = vpop.eup %1780  ;;  %v617_v12 = vxor.u32 2147483648, %v1779_v7  ;;  %v707_v16 = vsub.s32 4, %v2589_v36  ;;  %v850_v24 = vadd.s32 1, %v1634_v62  ;;  %v792_v44 = vmul.u32 %v2629_v32, %v776_v56 }
 0x163   : >> { %v614_v15 = vxor.u32 2147483648, %v1781_v13  ;;  %v700_v34 = vor.u32 4788187, %v699_v48  ;;  %v703_v33 = vcvt.s32.f32 %v696_v11  ;;  %v795_v26 = vadd.s32 1, %v2654_v3 }
 0x164   : >> { %v618_v43 = vsel %vm616_vm14, %v617_v12, %v1781_v13  ;;  %v847_v50 = vand.u32 8388607, %v840_v2  ;;  %vm851_vm9 = vcmp.gt.s32.totalorder %v850_v24, 0  ;;  %vm794_vm10 = vc.u32 %v2659_v20, %v2653_v8 }
 0x165   : >> { %v615_v61 = vsel %vm613_vm8, %v1779_v7, %v614_v15  ;;  %v701_v21 = vand.u32 2147483647, %v700_v34  ;;  %v946_v22 = vand.u32 2139095040, %v2607_v39  ;;  %v708_v32 = vsel %vm623_vm7, %v707_v16, %v2589_v36 }
 0x166   : >> { %v619_v28 = vsel %vm612_vm4, %v615_v61, %v618_v43  ;;  %v796_v30 = vsel %vm794_vm10, %v795_v26, %v2654_v3  ;;  %v852_v0 = vsel %vm851_vm9, %v850_v24, 0  ;;  %vm2684_vm11 = vcmp.le.f32.partialorder %v621_v23, 0.7853982 }
 0x167   : >> { %v620_v31 = vsel %vm609_vm6, nan, %v619_v28  ;;  %v704_v41 = vmul.f32 %v703_v33, %v701_v21  ;;  %v797_v29 = vadd.s32 %v796_v30, %v792_v44  ;;  %v854_v63 = vand.u32 31, %v852_v0 }
 0x168   : >> { %v2680_v25 = vmul.f32 %v620_v31, %v620_v31  ;;  %v710_v36 = vsel %vm2684_vm11, 0, %v708_v32  ;;  %v848_v19 = vor.u32 8388608, %v847_v50  ;;  %v947_v17 = vshrl.u32 %v946_v22, 23 }
 0x169   : >> { %v705_v35 = vxor.u32 2147483648, %v704_v41  ;;  %v798_v42 = vadd.s32 536870912, %v797_v29  ;;  %v855_v18 = vsub.s32 32, %v854_v63  ;;  %v857_v38 = vshll.u32 %v2002_v49, %v854_v63 }
 0x16a   : >> { %1173 = vrot.lane.b32.xlu1 %v2680_v25, %s2008_s5  ;;  %1165 = vrot.lane.b32.xlu0 %v2680_v25, %s2009_s26  ;;  %v860_v23 = vshll.u32 %v2003_v51, %v854_v63  ;;  %v853_v46 = vshrl.u32 %v852_v0, 5  ;;  %v863_v10 = vshll.u32 %v2004_v53, %v854_v63  ;;  %v866_v3 = vshll.u32 %v2005_v55, %v854_v63 }
 0x16b   : >> { %v706_v62 = vsel %vm623_vm7, %v705_v35, %v704_v41  ;;  %v2698_v52 = vshrl.u32 %v798_v42, 30  ;;  %v858_v56 = vshrl.u32 %v2003_v51, %v855_v18  ;;  %v861_v58 = vshrl.u32 %v2004_v53, %v855_v18 }
 0x16c   : >> { %v709_v14 = vsel %vm2684_vm11, %v2377_v47, %v706_v62  ;;  %v864_v11 = vshrl.u32 %v2005_v55, %v855_v18  ;;  %v869_v48 = vshll.u32 %v2006_v57, %v854_v63  ;;  %v867_v12 = vshrl.u32 %v2006_v57, %v855_v18 }
 0x16d   : >> { %1782 = vcosq.f32 %v709_v14  ;;  %v800_v7 = vshll.u32 %v2698_v52, 30  ;;  %v859_v45 = vor.u32 %v858_v56, %v857_v38  ;;  %v862_v13 = vor.u32 %v861_v58, %v860_v23 }
 0x16e   : >> { %1784 = vsinq.f32 %v709_v14  ;;  %v856_v24 = vshrl.u32 %v2002_v49, %v855_v18  ;;  %v870_v15 = vshrl.u32 %v2007_v1, %v855_v18  ;;  %vm872_vm12 = vcmp.lt.s32.totalorder %v853_v46, 1 }
 0x16f   : >> { %v2711_v16 = vsub.s32 %v797_v29, %v800_v7  ;;  %v714_v34 = vadd.s32 3, %v710_v36  ;;  %v865_v33 = vor.u32 %v864_v11, %v863_v10  ;;  %v868_v44 = vor.u32 %v867_v12, %v866_v3 }
 0x170   : >> { %vm875_vm13 = vcmp.lt.s32.totalorder %v853_v46, 4  ;;  %v871_v26 = vor.u32 %v870_v15, %v869_v48  ;;  %vm874_vm14 = vcmp.lt.s32.totalorder %v853_v46, 3  ;;  %v888_v50 = vshll.u32 %v848_v19, 8 }
 0x171   : >> { %v803_v43 = vsub.s32 0, %v2711_v16  ;;  %vm873_vm15 = vcmp.lt.s32.totalorder %v853_v46, 2  ;;  %v877_v61 = vsel %vm875_vm13, %v865_v33, 2102212464  ;;  %v880_v21 = vsel %vm872_vm12, %v859_v45, %v862_v13 }
 0x172   : >> { %v881_v22 = vsel %vm875_vm13, %v868_v44, 920167782  ;;  %v876_v32 = vsel %vm872_vm12, %v856_v24, %v859_v45  ;;  %v1638_v30 = vadd.s32 4294967169, %v947_v17  ;;  %v878_v0 = vsel %vm874_vm14, %v862_v13, %v877_v61 }
 0x173   : >> { %v1631_v28 = vmin.u32 %v803_v43, %v2711_v16  ;;  %v882_v31 = vsel %vm874_vm14, %v865_v33, %v881_v22  ;;  %v884_v41 = vsel %vm872_vm12, %v862_v13, %v865_v33  ;;  %v885_v29 = vsel %vm875_vm13, %v871_v26, 1326507024 }
 0x174   : >> { %v715_v60 = vand.u32 3, %v714_v34  ;;  %v883_v35 = vsel %vm873_vm15, %v880_v21, %v882_v31  ;;  %v886_v36 = vsel %vm874_vm14, %v868_v44, %v885_v29  ;;  %vm713_vm0 = vweird.f32 %v2377_v47 }
 0x175   : >> { %v805_v63 = vclz %v1631_v28  ;;  %v2724_v42 = vmul.u32.u64.low %v888_v50, %v883_v35  ;;  %v2725_v19 = vmul.u32.u64.high %v888_v50, %v883_v35, %v2724_v42  ;;  %v879_v38 = vsel %vm873_vm15, %v876_v32, %v878_v0 }
 0x176   : >> { %v887_v23 = vsel %vm873_vm15, %v884_v41, %v886_v36  ;;  %v943_v10 = vand.u32 2147483647, %v2607_v39  ;;  %v953_v14 = vadd.s32 1, %v1638_v30  ;;  %vm717_vm2 = vcmp.eq.s32.totalorder %v715_v60, 0 }
 0x177   : >> { %v1632_v18 = vadd.s32 4294967294, %v805_v63  ;;  %v2731_v17 = vmul.u32.u64.low %v888_v50, %v887_v23  ;;  %v2732_v62 = vmul.u32.u64.high %v888_v50, %v887_v23, %v2731_v17  ;;  %vm720_vm3 = vcmp.eq.s32.totalorder %v715_v60, 2 }
 0x178   : >> { %v793_v56 = vadd.s32 %v2653_v8, %v2659_v20  ;;  %v895_v7 = vmul.u32 %v888_v50, %v879_v38  ;;  %v898_v11 = vadd.s32 1, %v2725_v19  ;;  %vm954_vm5 = vcmp.gt.s32.totalorder %v953_v14, 0 }
 0x179   : >> { %vm1633_vm4 = vcmp.lt.s32.totalorder %v1632_v18, 0  ;;  %vm716_vm6 = vcmp.lt.s32.totalorder %v715_v60, 2  ;;  %vm897_vm7 = vc.u32 %v2732_v62, %v2724_v42  ;;  %v955_v15 = vsel %vm954_vm5, %v953_v14, 0 }
 0x17a   : >> { %v1783_v58 = vpop.eup %1782  ;;  %v808_v3 = vsel %vm1633_vm4, 0, %v1632_v18  ;;  %v899_v33 = vsel %vm897_vm7, %v898_v11, %v2725_v19  ;;  %v957_v26 = vand.u32 31, %v955_v15  ;;  %v950_v0 = vand.u32 8388607, %v943_v10 }
 0x17b   : >> { %v1785_v46 = vpop.eup %1784  ;;  %v721_v48 = vxor.u32 2147483648, %v1783_v58  ;;  %v809_v45 = vsub.s32 32, %v808_v3  ;;  %v810_v13 = vshll.u32 %v2711_v16, %v808_v3  ;;  %v813_v12 = vsub.s32 4294967266, %v808_v3 }
 0x17c   : >> { %v718_v24 = vxor.u32 2147483648, %v1785_v46  ;;  %v900_v43 = vadd.s32 %v899_v33, %v895_v7  ;;  %v958_v28 = vsub.s32 32, %v957_v26  ;;  %v960_v31 = vshll.u32 %v2002_v49, %v957_v26 }
 0x17d   : >> { %v722_v8 = vsel %vm720_vm3, %v721_v48, %v1785_v46  ;;  %v811_v20 = vshrl.u32 %v793_v56, %v809_v45  ;;  %v814_v34 = vadd.s32 127, %v813_v12  ;;  %v963_v60 = vshll.u32 %v2003_v51, %v957_v26 }
 0x17e   : >> { %v719_v44 = vsel %vm717_vm2, %v1783_v58, %v718_v24  ;;  %v901_v22 = vadd.s32 536870912, %v900_v43  ;;  %v961_v29 = vshrl.u32 %v2003_v51, %v958_v28  ;;  %v964_v63 = vshrl.u32 %v2004_v53, %v958_v28 }
 0x17f   : >> { %v723_v50 = vsel %vm716_vm6, %v719_v44, %v722_v8  ;;  %v812_v61 = vor.u32 %v811_v20, %v810_v13  ;;  %v815_v16 = vshll.u32 %v814_v34, 23  ;;  %v956_v35 = vshrl.u32 %v955_v15, 5 }
 0x180   : >> { %v724_v21 = vsel %vm713_vm0, nan, %v723_v50  ;;  %v2751_v41 = vshrl.u32 %v901_v22, 30  ;;  %v969_v36 = vshll.u32 %v2005_v55, %v957_v26  ;;  %v966_v38 = vshll.u32 %v2004_v53, %v957_v26 }
 0x181   : >> { %v2746_v32 = vmul.f32 %v724_v21, %v724_v21  ;;  %v816_v30 = vor.u32 4788187, %v815_v16  ;;  %v819_v47 = vcvt.s32.f32 %v812_v61  ;;  %v967_v23 = vshrl.u32 %v2005_v55, %v958_v28 }
 0x182   : >> { %v903_v18 = vshll.u32 %v2751_v41, 30  ;;  %v951_v17 = vor.u32 8388608, %v950_v0  ;;  %v959_v14 = vshrl.u32 %v2002_v49, %v958_v28  ;;  %v970_v56 = vshrl.u32 %v2006_v57, %v958_v28 }
 0x183   : >> { %1175 = vrot.lane.b32.xlu1 %v2746_v32, %s2008_s5  ;;  %1167 = vrot.lane.b32.xlu0 %v2746_v32, %s2009_s26  ;;  %v817_v19 = vand.u32 2147483647, %v816_v30  ;;  %v972_v58 = vshll.u32 %v2006_v57, %v957_v26  ;;  %v962_v7 = vor.u32 %v961_v29, %v960_v31  ;;  %v965_v11 = vor.u32 %v964_v63, %v963_v60 }
 0x184   : >> { %v904_v3 = vsub.s32 %v900_v43, %v903_v18  ;;  %v973_v46 = vshrl.u32 %v2007_v1, %v958_v28  ;;  %v2769_v48 = vmul.f32 0.017453292, %v2479_v9  ;;  %v971_v45 = vor.u32 %v970_v56, %v969_v36 }
 0x185   : >> { %vm975_vm8 = vcmp.lt.s32.totalorder %v956_v35, 1  ;;  %v820_v13 = vmul.f32 %v819_v47, %v817_v19  ;;  %v968_v24 = vor.u32 %v967_v23, %v966_v38  ;;  %vm977_vm9 = vcmp.lt.s32.totalorder %v956_v35, 3 }
 0x186   : >> { %v906_v12 = vsub.s32 0, %v904_v3  ;;  %v974_v15 = vor.u32 %v973_v46, %v972_v58  ;;  %vm978_vm10 = vcmp.lt.s32.totalorder %v956_v35, 4  ;;  %v991_v8 = vshll.u32 %v951_v17, 8 }
 0x187   : >> { %vm976_vm11 = vcmp.lt.s32.totalorder %v956_v35, 2  ;;  %v979_v34 = vsel %vm975_vm8, %v959_v14, %v962_v7  ;;  %v983_v33 = vsel %vm975_vm8, %v962_v7, %v965_v11  ;;  %vm739_vm12 = vcmp.lt.s32.totalorder %v2543_v37, 0 }
 0x188   : >> { %v1635_v20 = vmin.u32 %v906_v12, %v904_v3  ;;  %v980_v9 = vsel %vm978_vm10, %v968_v24, 2102212464  ;;  %v984_v44 = vsel %vm978_vm10, %v971_v45, 920167782  ;;  %v1049_v43 = vand.u32 2139095040, %v2769_v48 }
 0x189   : >> { %v821_v26 = vxor.u32 2147483648, %v820_v13  ;;  %v981_v61 = vsel %vm977_vm9, %v965_v11, %v980_v9  ;;  %v985_v16 = vsel %vm977_vm9, %v968_v24, %v984_v44  ;;  %v987_v28 = vsel %vm975_vm8, %v965_v11, %v968_v24 }
 0x18a   : >> { %v908_v50 = vclz %v1635_v20  ;;  %v982_v21 = vsel %vm976_vm11, %v979_v34, %v981_v61  ;;  %v986_v22 = vsel %vm976_vm11, %v983_v33, %v985_v16  ;;  %v988_v30 = vsel %vm978_vm10, %v974_v15, 1326507024 }
 0x18b   : >> { %v989_v31 = vsel %vm977_vm9, %v971_v45, %v988_v30  ;;  %v2784_v29 = vmul.u32.u64.low %v991_v8, %v986_v22  ;;  %v2785_v60 = vmul.u32.u64.high %v991_v8, %v986_v22, %v2784_v29  ;;  %vm2790_vm13 = vcmp.le.f32.partialorder %v737_v27, 0.7853982 }
 0x18c   : >> { %v1636_v0 = vadd.s32 4294967294, %v908_v50  ;;  %v990_v47 = vsel %vm976_vm11, %v987_v28, %v989_v31  ;;  %v1050_v36 = vshrl.u32 %v1049_v43, 23  ;;  %v896_v19 = vadd.s32 %v2724_v42, %v2732_v62 }
 0x18d   : >> { %v2797_v18 = vmul.u32.u64.low %v991_v8, %v990_v47  ;;  %v2798_v38 = vmul.u32.u64.high %v991_v8, %v990_v47, %v2797_v18  ;;  %v822_v23 = vsel %vm739_vm12, %v821_v26, %v820_v13  ;;  %v998_v14 = vmul.u32 %v991_v8, %v982_v21 }
 0x18e   : >> { %vm1637_vm14 = vcmp.lt.s32.totalorder %v1636_v0, 0  ;;  %v1642_v56 = vadd.s32 4294967169, %v1050_v36  ;;  %v1001_v35 = vadd.s32 1, %v2785_v60  ;;  %v823_v11 = vsub.s32 4, %v2698_v52 }
 0x18f   : >> { %v911_v17 = vsel %vm1637_vm14, 0, %v1636_v0  ;;  %v825_v42 = vsel %vm2790_vm13, %v2543_v37, %v822_v23  ;;  %vm1000_vm15 = vc.u32 %v2798_v38, %v2784_v29  ;;  %v1046_v12 = vand.u32 2147483647, %v2769_v48 }
 0x190   : >> { %v912_v27 = vsub.s32 32, %v911_v17  ;;  %v913_v58 = vshll.u32 %v904_v3, %v911_v17  ;;  %v916_v7 = vsub.s32 4294967266, %v911_v17  ;;  %v1056_v46 = vadd.s32 1, %v1642_v56 }
 0x191   : >> { %v1002_v13 = vsel %vm1000_vm15, %v1001_v35, %v2785_v60  ;;  %v824_v20 = vsel %vm739_vm12, %v823_v11, %v2698_v52  ;;  %1786 = vcosq.f32 %v825_v42  ;;  %v926_v43 = vsub.s32 4, %v2751_v41 }
 0x192   : >> { %v914_v62 = vshrl.u32 %v896_v19, %v912_v27  ;;  %v917_v45 = vadd.s32 127, %v916_v7  ;;  %vm1057_vm0 = vcmp.gt.s32.totalorder %v1056_v46, 0  ;;  %v1003_v15 = vadd.s32 %v1002_v13, %v998_v14 }
 0x193   : >> { %v1058_v8 = vsel %vm1057_vm0, %v1056_v46, 0  ;;  %1788 = vsinq.f32 %v825_v42  ;;  %v826_v50 = vsel %vm2790_vm13, 0, %v824_v20  ;;  %v1053_v21 = vand.u32 8388607, %v1046_v12 }
 0x194   : >> { %v915_v3 = vor.u32 %v914_v62, %v913_v58  ;;  %v918_v24 = vshll.u32 %v917_v45, 23  ;;  %v1060_v34 = vand.u32 31, %v1058_v8  ;;  %v1004_v44 = vadd.s32 536870912, %v1003_v15 }
 0x195   : >> { %vm2823_vm2 = vcmp.le.f32.partialorder %v840_v2, 0.7853982  ;;  %vm842_vm3 = vcmp.lt.s32.totalorder %v2594_v59, 0  ;;  %v2833_v63 = vand.u32 3, %v826_v50  ;;  %v1054_v23 = vor.u32 8388608, %v1053_v21 }
 0x196   : >> { %v919_v33 = vor.u32 4788187, %v918_v24  ;;  %v922_v9 = vcvt.s32.f32 %v915_v3  ;;  %v1061_v26 = vsub.s32 32, %v1060_v34  ;;  %v2817_v16 = vshrl.u32 %v1004_v44, 30 }
 0x197   : >> { %v1063_v22 = vshll.u32 %v2002_v49, %v1060_v34  ;;  %v1066_v31 = vshll.u32 %v2003_v51, %v1060_v34  ;;  %v2838_v2 = vsel %vm842_vm3, %v926_v43, %v2751_v41  ;;  %v1069_v47 = vshll.u32 %v2004_v53, %v1060_v34 }
 0x198   : >> { %v920_v61 = vand.u32 2147483647, %v919_v33  ;;  %v1064_v28 = vshrl.u32 %v2003_v51, %v1061_v26  ;;  %v1006_v0 = vshll.u32 %v2817_v16, 30  ;;  %v1067_v60 = vshrl.u32 %v2004_v53, %v1061_v26 }
 0x199   : >> { %v1070_v36 = vshrl.u32 %v2005_v55, %v1061_v26  ;;  %v1059_v17 = vshrl.u32 %v1058_v8, 5  ;;  %v1062_v51 = vshrl.u32 %v2002_v49, %v1061_v26  ;;  %v1072_v56 = vshll.u32 %v2005_v55, %v1060_v34 }
 0x19a   : >> { %v923_v30 = vmul.f32 %v922_v9, %v920_v61  ;;  %v2842_v18 = vsub.s32 %v1003_v15, %v1006_v0  ;;  %v1065_v14 = vor.u32 %v1064_v28, %v1063_v22  ;;  %v1073_v27 = vshrl.u32 %v2006_v57, %v1061_v26 }
 0x19b   : >> { %v1068_v53 = vor.u32 %v1067_v60, %v1066_v31  ;;  %v1075_v7 = vshll.u32 %v2006_v57, %v1060_v34  ;;  %v1071_v11 = vor.u32 %v1070_v36, %v1069_v47  ;;  %v1076_v49 = vshrl.u32 %v2007_v1, %v1061_v26 }
 0x19c   : >> { %v924_v19 = vxor.u32 2147483648, %v923_v30  ;;  %v1009_v58 = vsub.s32 0, %v2842_v18  ;;  %v1074_v46 = vor.u32 %v1073_v27, %v1072_v56  ;;  %vm832_vm4 = vcmp.eq.s32.totalorder %v2833_v63, 0 }
 0x19d   : >> { %vm1078_vm5 = vcmp.lt.s32.totalorder %v1059_v17, 1  ;;  %v1094_v42 = vshll.u32 %v1054_v23, 8  ;;  %v999_v62 = vadd.s32 %v2784_v29, %v2798_v38  ;;  %v1077_v57 = vor.u32 %v1076_v49, %v1075_v7 }
 0x19e   : >> { %v925_v41 = vsel %vm842_vm3, %v924_v19, %v923_v30  ;;  %v1639_v55 = vmin.u32 %v1009_v58, %v2842_v18  ;;  %vm1079_vm6 = vcmp.lt.s32.totalorder %v1059_v17, 2  ;;  %v1787_v45 = vpop.eup %1786  ;;  %vm1080_vm7 = vcmp.lt.s32.totalorder %v1059_v17, 3 }
 0x19f   : >> { %v928_v35 = vsel %vm2823_vm2, %v2594_v59, %v925_v41  ;;  %vm1081_vm8 = vcmp.lt.s32.totalorder %v1059_v17, 4  ;;  %v1082_v3 = vsel %vm1078_vm5, %v1062_v51, %v1065_v14  ;;  %v1086_v1 = vsel %vm1078_vm5, %v1065_v14, %v1068_v53 }
 0x1a0   : >> { %1790 = vcosq.f32 %v928_v35  ;;  %v1011_v13 = vclz %v1639_v55  ;;  %v1083_v24 = vsel %vm1081_vm8, %v1071_v11, 2102212464  ;;  %v1087_v15 = vsel %vm1081_vm8, %v1074_v46, 920167782  ;;  %v1789_v20 = vpop.eup %1788 }
 0x1a1   : >> { %1792 = vsinq.f32 %v928_v35  ;;  %v1090_v8 = vsel %vm1078_vm5, %v1068_v53, %v1071_v11  ;;  %v1084_v33 = vsel %vm1080_vm7, %v1068_v53, %v1083_v24  ;;  %v1088_v9 = vsel %vm1080_vm7, %v1071_v11, %v1087_v15 }
 0x1a2   : >> { %v1640_v34 = vadd.s32 4294967294, %v1011_v13  ;;  %v1091_v44 = vsel %vm1081_vm8, %v1077_v57, 1326507024  ;;  %v836_v43 = vxor.u32 2147483648, %v1787_v45  ;;  %v1085_v26 = vsel %vm1079_vm6, %v1082_v3, %v1084_v33 }
 0x1a3   : >> { %v1089_v29 = vsel %vm1079_vm6, %v1086_v1, %v1088_v9  ;;  %v1092_v38 = vsel %vm1080_vm7, %v1074_v46, %v1091_v44  ;;  %v833_v22 = vxor.u32 2147483648, %v1789_v20  ;;  %vm835_vm10 = vcmp.eq.s32.totalorder %v2833_v63, 2 }
 0x1a4   : >> { %vm1641_vm9 = vcmp.lt.s32.totalorder %v1640_v34, 0  ;;  %v1093_v50 = vsel %vm1079_vm6, %v1090_v8, %v1092_v38  ;;  %v2862_v61 = vmul.u32.u64.low %v1094_v42, %v1089_v29  ;;  %v2863_v21 = vmul.u32.u64.high %v1094_v42, %v1089_v29, %v2862_v61 }
 0x1a5   : >> { %v1014_v28 = vsel %vm1641_vm9, 0, %v1640_v34  ;;  %v2866_v30 = vmul.u32.u64.low %v1094_v42, %v1093_v50  ;;  %v2867_v0 = vmul.u32.u64.high %v1094_v42, %v1093_v50, %v2866_v30  ;;  %v1101_v36 = vmul.u32 %v1094_v42, %v1085_v26 }
 0x1a6   : >> { %v1015_v31 = vsub.s32 32, %v1014_v28  ;;  %v1016_v60 = vshll.u32 %v2842_v18, %v1014_v28  ;;  %v1019_v47 = vsub.s32 4294967266, %v1014_v28  ;;  %v929_v19 = vsel %vm2823_vm2, 0, %v2838_v2 }
 0x1a7   : >> { %v1104_v51 = vadd.s32 1, %v2863_v21  ;;  %vm831_vm11 = vcmp.lt.s32.totalorder %v2833_v63, 2  ;;  %v834_v14 = vsel %vm832_vm4, %v1787_v45, %v833_v22  ;;  %v837_v56 = vsel %vm835_vm10, %v836_v43, %v1789_v20 }
 0x1a8   : >> { %v1017_v23 = vshrl.u32 %v999_v62, %v1015_v31  ;;  %v1020_v17 = vadd.s32 127, %v1019_v47  ;;  %vm1103_vm12 = vc.u32 %v2867_v0, %v2862_v61  ;;  %v933_v52 = vand.u32 3, %v929_v19 }
 0x1a9   : >> { %v1105_v41 = vsel %vm1103_vm12, %v1104_v51, %v2863_v21  ;;  %vm829_vm13 = vweird.f32 %v2543_v37  ;;  %v838_v7 = vsel %vm831_vm11, %v834_v14, %v837_v56  ;;  %vm2886_vm0 = vcmp.le.f32.partialorder %v943_v10, 0.7853982 }
 0x1aa   : >> { %v1018_v18 = vor.u32 %v1017_v23, %v1016_v60  ;;  %v1021_v27 = vshll.u32 %v1020_v17, 23  ;;  %v1106_v2 = vadd.s32 %v1105_v41, %v1101_v36  ;;  %v839_v42 = vsel %vm829_vm13, nan, %v838_v7 }
 0x1ab   : >> { %vm935_vm14 = vcmp.eq.s32.totalorder %v933_v52, 0  ;;  %vm938_vm15 = vcmp.eq.s32.totalorder %v933_v52, 2  ;;  %vm934_vm2 = vcmp.lt.s32.totalorder %v933_v52, 2  ;;  %vm945_vm3 = vcmp.lt.s32.totalorder %v2607_v39, 0 }
 0x1ac   : >> { %v1022_v35 = vor.u32 4788187, %v1021_v27  ;;  %v1025_v11 = vcvt.s32.f32 %v1018_v18  ;;  %v1107_v46 = vadd.s32 536870912, %v1106_v2  ;;  %v1149_v13 = vsub.f32 0.5, %v2572_v40 }
 0x1ad   : >> { %v1791_v58 = vpop.eup %1790  ;;  %v1153_v15 = vmul.f32 0.5, %v839_v42  ;;  %vm932_vm4 = vweird.f32 %v2594_v59  ;;  %v1029_v44 = vsub.s32 4, %v2817_v16  ;;  %v1150_v30 = vsub.f32 0.5, %v2598_v54 }
 0x1ae   : >> { %v1793_v53 = vpop.eup %1792  ;;  %v939_v49 = vxor.u32 2147483648, %v1791_v58  ;;  %v1023_v55 = vand.u32 2147483647, %v1022_v35  ;;  %v2882_v62 = vshrl.u32 %v1107_v46, 30  ;;  %v1102_v47 = vadd.s32 %v2862_v61, %v2867_v0 }
 0x1af   : >> { %v936_v63 = vxor.u32 2147483648, %v1793_v53  ;;  %v1157_v9 = vadd.f32 %v1153_v15, %v1149_v13  ;;  %v1030_v22 = vsel %vm945_vm3, %v1029_v44, %v2817_v16  ;;  %vm1048_vm9 = vcmp.lt.s32.totalorder %v2769_v48, 0 }
 0x1b0   : >> { %v1026_v45 = vmul.f32 %v1025_v11, %v1023_v55  ;;  %v1109_v37 = vshll.u32 %v2882_v62, 30  ;;  %v940_v24 = vsel %vm938_vm15, %v939_v49, %v1793_v53  ;;  %v1032_v36 = vsel %vm2886_vm0, 0, %v1030_v22 }
 0x1b1   : >> { %v937_v3 = vsel %vm935_vm14, %v1791_v58, %v936_v63  ;;  %v1036_v52 = vand.u32 3, %v1032_v36  ;;  %vm2921_vm10 = vcmp.le.f32.partialorder %v1046_v12, 0.7853982  ;;  %vm1035_vm11 = vweird.f32 %v2607_v39 }
 0x1b2   : >> { %v1027_v1 = vxor.u32 2147483648, %v1026_v45  ;;  %v1110_v8 = vsub.s32 %v1106_v2, %v1109_v37  ;;  %v941_v10 = vsel %vm934_vm2, %v937_v3, %v940_v24  ;;  %v1152_v24 = vsub.f32 0.5, %v2746_v32 }
 0x1b3   : >> { %v942_v38 = vsel %vm932_vm4, nan, %v941_v10  ;;  %vm1038_vm6 = vcmp.eq.s32.totalorder %v1036_v52, 0  ;;  %vm1041_vm7 = vcmp.eq.s32.totalorder %v1036_v52, 2  ;;  %vm1037_vm8 = vcmp.lt.s32.totalorder %v1036_v52, 2 }
 0x1b4   : >> { %v1028_v20 = vsel %vm945_vm3, %v1027_v1, %v1026_v45  ;;  %v1112_v33 = vsub.s32 0, %v1110_v8  ;;  %v1154_v31 = vmul.f32 0.5, %v942_v38 }
 0x1b5   : >> { %v1031_v34 = vsel %vm2886_vm0, %v2607_v39, %v1028_v20  ;;  %v1151_v39 = vsub.f32 0.5, %v2680_v25 }
 0x1b6   : >> { %1794 = vcosq.f32 %v1031_v34  ;;  %v1643_v43 = vmin.u32 %v1112_v33, %v1110_v8  ;;  %v1158_v56 = vadd.f32 %v1154_v31, %v1150_v30  ;;  %v1132_v33 = vsub.s32 4, %v2882_v62 }
 0x1b7   : >> { %1796 = vsinq.f32 %v1031_v34 }
 0x1b8   : >> { %v1114_v50 = vclz %v1643_v43  ;;  %v1133_v38 = vsel %vm1048_vm9, %v1132_v33, %v2882_v62 }
 0x1ba   : >> { %v1644_v28 = vadd.s32 4294967294, %v1114_v50 }
 0x1bc   : >> { %vm1645_vm5 = vcmp.lt.s32.totalorder %v1644_v28, 0 }
 0x1bd   : >> { %v1170_v26 = vpop.permute.xlu1 %1169  ;;  %v1162_v29 = vpop.permute.xlu0 %1161  ;;  %v1117_v19 = vsel %vm1645_vm5, 0, %v1644_v28 }
 0x1be   : >> { %v1177_v59 = vsel %vm277_vm1, %v1162_v29, %v1170_v26  ;;  %v1118_v17 = vsub.s32 32, %v1117_v19  ;;  %v1119_v51 = vshll.u32 %v1110_v8, %v1117_v19  ;;  %v1122_v14 = vsub.s32 4294967266, %v1117_v19 }
 0x1bf   : >> { %v1181_v21 = vmul.f32 %v1177_v59, %v1157_v9 }
 0x1c0   : >> { %v1120_v41 = vshrl.u32 %v1102_v47, %v1118_v17  ;;  %v1123_v58 = vadd.s32 127, %v1122_v14  ;;  %v1135_v47 = vsel %vm2921_vm10, 0, %v1133_v38 }
 0x1c1   : >> { %v1185_v60 = vadd.f32 %v1181_v21, %v2572_v40 }
 0x1c2   : >> { %v1121_v0 = vor.u32 %v1120_v41, %v1119_v51  ;;  %v1124_v2 = vshll.u32 %v1123_v58, 23 }
 0x1c3   : >> { %v1189_v23 = vmax.f32 %v1185_v60, 0.0  ;;  %v1795_v61 = vpop.eup %1794 }
 0x1c4   : >> { %v1797_v7 = vpop.eup %1796  ;;  %v1042_v35 = vxor.u32 2147483648, %v1795_v61  ;;  %v1125_v63 = vor.u32 4788187, %v1124_v2  ;;  %v1128_v49 = vcvt.s32.f32 %v1121_v0 }
 0x1c5   : >> { %v1193_v16 = vmin.f32 %v1189_v23, 1.0  ;;  %v1172_v18 = vpop.permute.xlu1 %1171  ;;  %v1164_v27 = vpop.permute.xlu0 %1163  ;;  %v1039_v46 = vxor.u32 2147483648, %v1797_v7 }
 0x1c6   : >> { %v1178_v40 = vsel %vm277_vm1, %v1164_v27, %v1172_v18  ;;  %v1126_v42 = vand.u32 2147483647, %v1125_v63  ;;  %v1043_v37 = vsel %vm1041_vm7, %v1042_v35, %v1797_v7 }
 0x1c7   : >> { %1798 = vrsqrt.f32 %v1193_v16  ;;  %v1182_v53 = vmul.f32 %v1178_v40, %v1158_v56  ;;  %v1225_v11 = vsub.f32 1.0, %v1193_v16  ;;  %v1040_v45 = vsel %vm1038_vm6, %v1795_v61, %v1039_v46 }
 0x1c8   : >> { %v1129_v13 = vmul.f32 %v1128_v49, %v1126_v42  ;;  %v1044_v1 = vsel %vm1037_vm8, %v1040_v45, %v1043_v37  ;;  %vm1199_vm12 = vcmp.eq.f32.partialorder %v1193_v16, inf  ;;  %v1202_v26 = vand.u32 2147483648, %v1193_v16 }
 0x1c9   : >> { %v1186_v55 = vadd.f32 %v1182_v53, %v2598_v54  ;;  %1800 = vrsqrt.f32 %v1225_v11  ;;  %v1045_v10 = vsel %vm1035_vm11, nan, %v1044_v1  ;;  %vm1201_vm13 = vcmp.eq.f32.partialorder %v1193_v16, 0.0 }
 0x1ca   : >> { %v1130_v54 = vxor.u32 2147483648, %v1129_v13  ;;  %v1155_v9 = vmul.f32 0.5, %v1045_v10  ;;  %vm1231_vm14 = vcmp.eq.f32.partialorder %v1225_v11, inf  ;;  %v1234_v59 = vand.u32 2147483648, %v1225_v11 }
 0x1cb   : >> { %v1190_v57 = vmax.f32 %v1186_v55, 0.0  ;;  %vm1233_vm15 = vcmp.eq.f32.partialorder %v1225_v11, 0.0  ;;  %v1139_v56 = vand.u32 3, %v1135_v47  ;;  %vm1138_vm8 = vweird.f32 %v2769_v48 }
 0x1cc   : >> { %v1131_v8 = vsel %vm1048_vm9, %v1130_v54, %v1129_v13  ;;  %v1159_v21 = vadd.f32 %v1155_v9, %v1151_v39 }
 0x1cd   : >> { %v2916_v3 = vmin.f32 %v1190_v57, 1.0  ;;  %v1134_v20 = vsel %vm2921_vm10, %v2769_v48, %v1131_v8  ;;  %vm1141_vm5 = vcmp.eq.s32.totalorder %v1139_v56, 0  ;;  %vm1144_vm6 = vcmp.eq.s32.totalorder %v1139_v56, 2 }
 0x1ce   : >> { %vm1140_vm7 = vcmp.lt.s32.totalorder %v1139_v56, 2 }
 0x1cf   : >> { %1802 = vrsqrt.f32 %v2916_v3  ;;  %v1226_v15 = vsub.f32 1.0, %v2916_v3  ;;  %vm1206_vm0 = vcmp.eq.f32.partialorder %v2916_v3, inf  ;;  %vm1208_vm2 = vcmp.eq.f32.partialorder %v2916_v3, 0.0 }
 0x1d0   : >> { %v1209_v52 = vand.u32 2147483648, %v2916_v3 }
 0x1d1   : >> { %1804 = vrsqrt.f32 %v1226_v15  ;;  %vm1238_vm3 = vcmp.eq.f32.partialorder %v1226_v15, inf  ;;  %vm1240_vm4 = vcmp.eq.f32.partialorder %v1226_v15, 0.0  ;;  %v1241_v40 = vand.u32 2147483648, %v1226_v15 }
 0x1d2   : >> { %1806 = vcosq.f32 %v1134_v20 }
 0x1d3   : >> { %1808 = vsinq.f32 %v1134_v20 }
 0x1d4   : >> { %v1799_v12 = vpop.eup %1798 }
 0x1d5   : >> { %v1198_v34 = vmul.f32 %v1799_v12, %v1193_v16 }
 0x1d6   : >> { %v1801_v43 = vpop.eup %1800 }
 0x1d7   : >> { %v1200_v44 = vsel %vm1199_vm12, %v1193_v16, %v1198_v34  ;;  %v1230_v29 = vmul.f32 %v1801_v43, %v1225_v11 }
 0x1d8   : >> { %v2938_v50 = vsel %vm1201_vm13, %v1202_v26, %v1200_v44 }
 0x1d9   : >> { %v1232_v22 = vsel %vm1231_vm14, %v1225_v11, %v1230_v29  ;;  %v2948_v62 = vand.u32 2147483647, %v2938_v50 }
 0x1da   : >> { %v2940_v28 = vsel %vm1233_vm15, %v1234_v59, %v1232_v22 }
 0x1db   : >> { %v2945_v36 = vand.u32 2147483647, %v2940_v28 }
 0x1dc   : >> { %v1803_v30 = vpop.eup %1802  ;;  %v1174_v31 = vpop.permute.xlu1 %1173 }
 0x1dd   : >> { %v1166_v60 = vpop.permute.xlu0 %1165  ;;  %v1205_v23 = vmul.f32 %v1803_v30, %v2916_v3  ;;  %v1260_v51 = vmax.f32 %v2945_v36, %v2948_v62  ;;  %v1259_v37 = vmin.f32 %v2945_v36, %v2948_v62 }
 0x1de   : >> { %v1179_v19 = vsel %vm277_vm1, %v1166_v60, %v1174_v31  ;;  %v1805_v14 = vpop.eup %1804 }
 0x1df   : >> { %v1183_v17 = vmul.f32 %v1179_v19, %v1159_v21  ;;  %v1807_v16 = vpop.eup %1806  ;;  %v1207_v27 = vsel %vm1206_vm0, %v2916_v3, %v1205_v23  ;;  %v1237_v41 = vmul.f32 %v1805_v14, %v1226_v15  ;;  %1810 = vrcp.f32 %v1260_v51 }
 0x1e0   : >> { %v1809_v58 = vpop.eup %1808  ;;  %v1145_v0 = vxor.u32 2147483648, %v1807_v16  ;;  %v2963_v7 = vsel %vm1208_vm2, %v1209_v52, %v1207_v27  ;;  %vm1281_vm2 = vcmp.gt.f32.partialorder %v2948_v62, %v2945_v36 }
 0x1e1   : >> { %v1187_v18 = vadd.f32 %v1183_v17, %v2680_v25  ;;  %v1142_v61 = vxor.u32 2147483648, %v1809_v58  ;;  %v1239_v53 = vsel %vm1238_vm3, %v1226_v15, %v1237_v41  ;;  %v2971_v49 = vand.u32 2147483647, %v2963_v7 }
 0x1e2   : >> { %v2965_v25 = vsel %vm1240_vm4, %v1241_v40, %v1239_v53  ;;  %v1146_v63 = vsel %vm1144_vm6, %v1145_v0, %v1809_v58  ;;  %vm1287_vm3 = vcmp.lt.s32.totalorder %v2940_v28, 0  ;;  %vm1284_vm4 = vcmp.lt.f32.partialorder %v2940_v28, 0.0 }
 0x1e3   : >> { %v1191_v2 = vmax.f32 %v1187_v18, 0.0  ;;  %v2968_v11 = vand.u32 2147483647, %v2965_v25  ;;  %v1143_v46 = vsel %vm1141_vm5, %v1807_v16, %v1142_v61  ;;  %vm1289_vm5 = vcmp.eq.f32.partialorder %v2938_v50, 0.0 }
 0x1e4   : >> { %v1147_v57 = vsel %vm1140_vm7, %v1143_v46, %v1146_v63  ;;  %vm1291_vm6 = vcmp.ne.f32.partialorder %v2940_v28, %v2940_v28  ;;  %vm1292_vm7 = vcmp.ne.f32.partialorder %v2938_v50, %v2938_v50 }
 0x1e5   : >> { %v1195_v35 = vmin.f32 %v1191_v2, 1.0  ;;  %v1307_v42 = vmax.f32 %v2968_v11, %v2971_v49  ;;  %v1148_v45 = vsel %vm1138_vm8, nan, %v1147_v57  ;;  %v1306_v26 = vmin.f32 %v2968_v11, %v2971_v49  ;;  %vm1293_vm8 = vmor %vm1291_vm6, %vm1292_vm7 }
 0x1e6   : >> { %v1156_v54 = vmul.f32 0.5, %v1148_v45 }
 0x1e7   : >> { %1812 = vrsqrt.f32 %v1195_v35  ;;  %v1227_v55 = vsub.f32 1.0, %v1195_v35  ;;  %vm1213_vm9 = vcmp.eq.f32.partialorder %v1195_v35, inf  ;;  %v1216_v33 = vand.u32 2147483648, %v1195_v35 }
 0x1e8   : >> { %v1160_v8 = vadd.f32 %v1156_v54, %v1152_v24  ;;  %vm1215_vm10 = vcmp.eq.f32.partialorder %v1195_v35, 0.0 }
 0x1e9   : >> { %1814 = vrsqrt.f32 %v1227_v55  ;;  %vm1245_vm11 = vcmp.eq.f32.partialorder %v1227_v55, inf  ;;  %v1248_v22 = vand.u32 2147483648, %v1227_v55  ;;  %vm1247_vm12 = vcmp.eq.f32.partialorder %v1227_v55, 0.0 }
 0x1ea   : >> { %1816 = vrcp.f32 %v1307_v42 }
 0x1ec   : >> { %v1811_v13 = vpop.eup %1810 }
 0x1ed   : >> { %v2978_v3 = vmul.f32 %v1811_v13, %v1259_v37 }
 0x1ef   : >> { %v2983_v1 = vmul.f32 %v2978_v3, %v2978_v3 }
 0x1f1   : >> { %v1264_v15 = vmul.f32 0.002785687, %v2983_v1 }
 0x1f3   : >> { %v1265_v12 = vadd.f32 -0.015866, %v1264_v15 }
 0x1f4   : >> { %v1813_v48 = vpop.eup %1812 }
 0x1f5   : >> { %v1212_v20 = vmul.f32 %v1813_v48, %v1195_v35  ;;  %v1176_v10 = vpop.permute.xlu1 %1175  ;;  %v1168_v34 = vpop.permute.xlu0 %1167  ;;  %v1266_v43 = vmul.f32 %v1265_v12, %v2983_v1 }
 0x1f6   : >> { %v1815_v39 = vpop.eup %1814  ;;  %v1180_v9 = vsel %vm277_vm1, %v1168_v34, %v1176_v10 }
 0x1f7   : >> { %v1214_v44 = vsel %vm1213_vm9, %v1195_v35, %v1212_v20  ;;  %v1817_v29 = vpop.eup %1816  ;;  %v1184_v38 = vmul.f32 %v1180_v9, %v1160_v8  ;;  %v1244_v59 = vmul.f32 %v1815_v39, %v1227_v55  ;;  %v1267_v30 = vadd.f32 0.04247222, %v1266_v43 }
 0x1f8   : >> { %v2992_v21 = vsel %vm1215_vm10, %v1216_v33, %v1214_v44  ;;  %v2994_v31 = vmul.f32 %v1817_v29, %v1306_v26  ;;  %vm1297_vm9 = vcmp.eq.s32.totalorder %v2945_v36, inf  ;;  %vm1298_vm10 = vcmp.eq.s32.totalorder %v2948_v62, inf }
 0x1f9   : >> { %v1188_v60 = vadd.f32 %v1184_v38, %v2746_v32  ;;  %v1246_v47 = vsel %vm1245_vm11, %v1227_v55, %v1244_v59  ;;  %v1268_v23 = vmul.f32 %v1267_v30, %v2983_v1  ;;  %v3008_v56 = vand.u32 2147483647, %v2992_v21  ;;  %vm1299_vm11 = vmand %vm1297_vm9, %vm1298_vm10 }
 0x1fa   : >> { %v2997_v19 = vsel %vm1247_vm12, %v1248_v22, %v1246_v47  ;;  %v3002_v17 = vmul.f32 %v2994_v31, %v2994_v31  ;;  %vm1328_vm12 = vcmp.gt.f32.partialorder %v2971_v49, %v2968_v11 }
 0x1fb   : >> { %v1192_v51 = vmax.f32 %v1188_v60, 0.0  ;;  %v3005_v14 = vand.u32 2147483647, %v2997_v19  ;;  %v1269_v16 = vadd.f32 -0.074975304, %v1268_v23  ;;  %vm1385_vm9 = vcmp.ne.f32.partialorder %v2997_v19, %v2997_v19 }
 0x1fc   : >> { %v1311_v32 = vmul.f32 0.002785687, %v3002_v17  ;;  %vm1378_vm10 = vcmp.lt.f32.partialorder %v2997_v19, 0.0 }
 0x1fd   : >> { %v1196_v18 = vmin.f32 %v1192_v51, 1.0  ;;  %v1354_v27 = vmax.f32 %v3005_v14, %v3008_v56  ;;  %v1270_v41 = vmul.f32 %v1269_v16, %v2983_v1  ;;  %v1353_v13 = vmin.f32 %v3005_v14, %v3008_v56 }
 0x1fe   : >> { %v1312_v58 = vadd.f32 -0.015866, %v1311_v32  ;;  %vm1375_vm7 = vcmp.gt.f32.partialorder %v3008_v56, %v3005_v14 }
 0x1ff   : >> { %1818 = vrsqrt.f32 %v1196_v18  ;;  %v1228_v52 = vsub.f32 1.0, %v1196_v18  ;;  %v1271_v40 = vadd.f32 0.1064488, %v1270_v41  ;;  %vm1220_vm13 = vcmp.eq.f32.partialorder %v1196_v18, inf }
 0x200   : >> { %v1313_v61 = vmul.f32 %v1312_v58, %v3002_v17  ;;  %1820 = vrcp.f32 %v1354_v27  ;;  %v1223_v10 = vand.u32 2147483648, %v1196_v18  ;;  %vm1222_vm14 = vcmp.eq.f32.partialorder %v1196_v18, 0.0 }
 0x201   : >> { %1822 = vrsqrt.f32 %v1228_v52  ;;  %v1272_v0 = vmul.f32 %v1271_v40, %v2983_v1  ;;  %vm1252_vm15 = vcmp.eq.f32.partialorder %v1228_v52, inf  ;;  %v1255_v43 = vand.u32 2147483648, %v1228_v52 }
 0x202   : >> { %v1314_v2 = vadd.f32 0.04247222, %v1313_v61  ;;  %vm1254_vm0 = vcmp.eq.f32.partialorder %v1228_v52, 0.0  ;;  %v2010_v61 = vmov 0.0  }
 0x203   : >> { %v1273_v53 = vadd.f32 -0.14207031, %v1272_v0  ;;  %v1288_v0 = vsel %vm1287_vm3, 3.1415927, %v2010_v61  ;;  %vm1344_vm3 = vcmp.eq.s32.totalorder %v2968_v11, inf }
 0x204   : >> { %v1315_v35 = vmul.f32 %v1314_v2, %v3002_v17 }
 0x205   : >> { %v1274_v46 = vmul.f32 %v1273_v53, %v2983_v1 }
 0x206   : >> { %v1316_v63 = vadd.f32 -0.074975304, %v1315_v35 }
 0x207   : >> { %v1275_v55 = vadd.f32 0.19993454, %v1274_v46 }
 0x208   : >> { %v1317_v42 = vmul.f32 %v1316_v63, %v3002_v17 }
 0x209   : >> { %v1276_v57 = vmul.f32 %v1275_v55, %v2983_v1 }
 0x20a   : >> { %v1318_v45 = vadd.f32 0.1064488, %v1317_v42 }
 0x20b   : >> { %v1277_v15 = vadd.f32 -0.33333147, %v1276_v57  ;;  %v2011_v57 = vmov 0.7853982  }
 0x20c   : >> { %v1819_v37 = vpop.eup %1818  ;;  %v1319_v48 = vmul.f32 %v1318_v45, %v3002_v17  ;;  %v1296_v45 = vsel %vm1284_vm4, 2.3561945, %v2011_v57 }
 0x20d   : >> { %v1821_v24 = vpop.eup %1820  ;;  %v1219_v54 = vmul.f32 %v1819_v37, %v1196_v18  ;;  %v1278_v34 = vmul.f32 %v1277_v15, %v2983_v1 }
 0x20e   : >> { %v3023_v8 = vmul.f32 %v1821_v24, %v1353_v13  ;;  %v1823_v20 = vpop.eup %1822  ;;  %v1320_v33 = vadd.f32 -0.14207031, %v1319_v48 }
 0x20f   : >> { %v1221_v12 = vsel %vm1220_vm13, %v1196_v18, %v1219_v54  ;;  %v1251_v39 = vmul.f32 %v1823_v20, %v1228_v52  ;;  %v1279_v26 = vmul.f32 %v1278_v34, %v2978_v3  ;;  %vm1334_vm13 = vcmp.lt.s32.totalorder %v2965_v25, 0 }
 0x210   : >> { %v3028_v9 = vmul.f32 %v3023_v8, %v3023_v8  ;;  %v3030_v44 = vsel %vm1222_vm14, %v1223_v10, %v1221_v12  ;;  %v1321_v29 = vmul.f32 %v1320_v33, %v3002_v17  ;;  %vm1336_vm14 = vcmp.eq.f32.partialorder %v2963_v7, 0.0 }
 0x211   : >> { %v1253_v38 = vsel %vm1252_vm15, %v1228_v52, %v1251_v39  ;;  %v1280_v22 = vadd.f32 %v1279_v26, %v2978_v3  ;;  %v3042_v23 = vand.u32 2147483647, %v3030_v44  ;;  %vm1338_vm15 = vcmp.ne.f32.partialorder %v2965_v25, %v2965_v25 }
 0x212   : >> { %v1358_v59 = vmul.f32 0.002785687, %v3028_v9  ;;  %v3035_v1 = vsel %vm1254_vm0, %v1255_v43, %v1253_v38  ;;  %v1322_v30 = vadd.f32 0.19993454, %v1321_v29  ;;  %vm1331_vm0 = vcmp.lt.f32.partialorder %v2965_v25, 0.0 }
 0x213   : >> { %v3039_v47 = vand.u32 2147483647, %v3035_v1  ;;  %v1282_v51 = vsub.f32 1.5707964, %v1280_v22  ;;  %v1335_v62 = vsel %vm1334_vm13, 3.1415927, %v2010_v61  ;;  %vm1386_vm13 = vcmp.ne.f32.partialorder %v2992_v21, %v2992_v21 }
 0x214   : >> { %v1359_v60 = vadd.f32 -0.015866, %v1358_v59  ;;  %v1323_v16 = vmul.f32 %v1322_v30, %v3002_v17  ;;  %v1302_v12 = vand.u32 2147483648, %v2938_v50  ;;  %v1343_v11 = vsel %vm1331_vm0, 2.3561945, %v2011_v57  ;;  %v298_v59 = vld [vmem:[%s3089_s27 + $0x8] sm:$0xff] }
 0x215   : >> { %v1401_v18 = vmax.f32 %v3039_v47, %v3042_v23  ;;  %v1283_v3 = vsel %vm1281_vm2, %v1282_v51, %v1280_v22  ;;  %vm1339_vm2 = vcmp.ne.f32.partialorder %v2963_v7, %v2963_v7  ;;  %v1400_v48 = vmin.f32 %v3039_v47, %v3042_v23 }
 0x216   : >> { %v1360_v32 = vmul.f32 %v1359_v60, %v3028_v9  ;;  %v1324_v27 = vadd.f32 -0.33333147, %v1323_v16  ;;  %v1285_v41 = vsub.f32 3.1415927, %v1283_v3  ;;  %v1349_v43 = vand.u32 2147483648, %v2963_v7 }
 0x217   : >> { %1824 = vrcp.f32 %v1401_v18 }
 0x218   : >> { %v1361_v58 = vadd.f32 0.04247222, %v1360_v32  ;;  %v1325_v52 = vmul.f32 %v1324_v27, %v3002_v17  ;;  %v1286_v40 = vsel %vm1284_vm4, %v1285_v41, %v1283_v3  ;;  %vm1340_vm4 = vmor %vm1338_vm15, %vm1339_vm2  ;;  %vm1392_vm15 = vcmp.eq.s32.totalorder %v3008_v56, inf }
 0x219   : >> { %v1290_v53 = vsel %vm1289_vm5, %v1288_v0, %v1286_v40  ;;  %vm1345_vm5 = vcmp.eq.s32.totalorder %v2971_v49, inf  ;;  %v297_v49 = vld [vmem:[%s3089_s27] sm:$0xff]  ;;  %vm1422_vm2 = vcmp.gt.f32.partialorder %v3042_v23, %v3039_v47 }
 0x21a   : >> { %v1362_v2 = vmul.f32 %v1361_v58, %v3028_v9  ;;  %v1326_v35 = vmul.f32 %v1325_v52, %v2994_v31  ;;  %v1294_v63 = vsel %vm1293_vm8, nan, %v1290_v53  ;;  %vm1346_vm6 = vmand %vm1344_vm3, %vm1345_vm5  ;;  %vm1381_vm8 = vcmp.lt.s32.totalorder %v2997_v19, 0 }
 0x21b   : >> { %v1300_v37 = vsel %vm1299_vm11, %v1296_v45, %v1294_v63  ;;  %vm1391_vm11 = vcmp.eq.s32.totalorder %v3005_v14, inf  ;;  %v1390_v19 = vsel %vm1378_vm10, 2.3561945, %v2011_v57  ;;  %vm1428_vm3 = vcmp.lt.s32.totalorder %v3035_v1, 0 }
 0x21c   : >> { %v1363_v46 = vadd.f32 -0.074975304, %v1362_v2  ;;  %v1327_v17 = vadd.f32 %v1326_v35, %v2994_v31  ;;  %v1301_v24 = vand.u32 2147483647, %v1300_v37  ;;  %v1396_v37 = vand.u32 2147483648, %v2992_v21 }
 0x21d   : >> { %vm1425_vm5 = vcmp.lt.f32.partialorder %v3035_v1, 0.0 }
 0x21e   : >> { %v1364_v55 = vmul.f32 %v1363_v46, %v3028_v9  ;;  %v1329_v42 = vsub.f32 1.5707964, %v1327_v17  ;;  %v1303_v50 = vor.u32 %v1302_v12, %v1301_v24 }
 0x220   : >> { %v1365_v36 = vadd.f32 0.1064488, %v1364_v55  ;;  %v1330_v31 = vsel %vm1328_vm12, %v1329_v42, %v1327_v17  ;;  %v1445_v32 = vmul.f32 %v1303_v50, %v297_v49  ;;  %v1382_v17 = vsel %vm1381_vm8, 3.1415927, %v2010_v61 }
 0x221   : >> { %v1332_v13 = vsub.f32 3.1415927, %v1330_v31  ;;  %vm1383_vm12 = vcmp.eq.f32.partialorder %v2992_v21, 0.0  ;;  %vm1433_vm8 = vcmp.ne.f32.partialorder %v3030_v44, %v3030_v44 }
 0x222   : >> { %v1366_v28 = vmul.f32 %v1365_v36, %v3028_v9 }
 0x223   : >> { %v1333_v54 = vsel %vm1331_vm0, %v1332_v13, %v1330_v31  ;;  %vm1393_vm0 = vmand %vm1391_vm11, %vm1392_vm15  ;;  %v299_v31 = vld [vmem:[%s3089_s27 + $0x10] sm:$0xff] }
 0x224   : >> { %v1367_v15 = vadd.f32 -0.14207031, %v1366_v28  ;;  %v1825_v20 = vpop.eup %1824  ;;  %v1337_v10 = vsel %vm1336_vm14, %v1335_v62, %v1333_v54  ;;  %vm1387_vm14 = vmor %vm1385_vm9, %vm1386_vm13 }
 0x225   : >> { %v1341_v25 = vsel %vm1340_vm4, nan, %v1337_v10  ;;  %v1403_v33 = vmul.f32 %v1825_v20, %v1400_v48  ;;  %vm1432_vm4 = vcmp.ne.f32.partialorder %v3035_v1, %v3035_v1 }
 0x226   : >> { %v1368_v34 = vmul.f32 %v1367_v15, %v3028_v9  ;;  %v1347_v39 = vsel %vm1346_vm6, %v1343_v11, %v1341_v25  ;;  %vm1438_vm6 = vcmp.eq.s32.totalorder %v3039_v47, inf  ;;  %vm1434_vm9 = vmor %vm1432_vm4, %vm1433_vm8  ;;  %v1443_v47 = vand.u32 2147483648, %v3030_v44 }
 0x227   : >> { %v1348_v26 = vand.u32 2147483647, %v1347_v39  ;;  %v1404_v38 = vmul.f32 %v1403_v33, %v1403_v33 }
 0x228   : >> { %v1369_v29 = vadd.f32 0.19993454, %v1368_v34  ;;  %v1429_v34 = vsel %vm1428_vm3, 3.1415927, %v2010_v61 }
 0x229   : >> { %v1350_v22 = vor.u32 %v1349_v43, %v1348_v26  ;;  %v1405_v60 = vmul.f32 0.002785687, %v1404_v38  ;;  %v1437_v43 = vsel %vm1425_vm5, 2.3561945, %v2011_v57  ;;  %v300_v26 = vld [vmem:[%s3089_s27 + $0x18] sm:$0xff] }
 0x22a   : >> { %v1370_v30 = vmul.f32 %v1369_v29, %v3028_v9 }
 0x22b   : >> { %v1406_v16 = vadd.f32 -0.015866, %v1405_v60  ;;  %v1446_v18 = vmul.f32 %v1350_v22, %v298_v59 }
 0x22c   : >> { %v1371_v51 = vadd.f32 -0.33333147, %v1370_v30 }
 0x22d   : >> { %v1407_v27 = vmul.f32 %v1406_v16, %v1404_v38  ;;  %v1449_v41 = vadd.f32 %v1446_v18, %v1445_v32 }
 0x22e   : >> { %v1372_v3 = vmul.f32 %v1371_v51, %v3028_v9 }
 0x22f   : >> { %v1408_v58 = vadd.f32 0.04247222, %v1407_v27 }
 0x230   : >> { %v1373_v7 = vmul.f32 %v1372_v3, %v3023_v8 }
 0x231   : >> { %v1409_v40 = vmul.f32 %v1408_v58, %v1404_v38 }
 0x232   : >> { %v1374_v52 = vadd.f32 %v1373_v7, %v3023_v8 }
 0x233   : >> { %v1410_v2 = vadd.f32 -0.074975304, %v1409_v40 }
 0x234   : >> { %v1376_v0 = vsub.f32 1.5707964, %v1374_v52 }
 0x235   : >> { %v1411_v35 = vmul.f32 %v1410_v2, %v1404_v38 }
 0x236   : >> { %v1377_v53 = vsel %vm1375_vm7, %v1376_v0, %v1374_v52  ;;  %vm1430_vm7 = vcmp.eq.f32.partialorder %v3030_v44, 0.0 }
 0x237   : >> { %v1379_v46 = vsub.f32 3.1415927, %v1377_v53  ;;  %v1412_v9 = vadd.f32 0.1064488, %v1411_v35 }
 0x239   : >> { %v1380_v8 = vsel %vm1378_vm10, %v1379_v46, %v1377_v53  ;;  %v1413_v55 = vmul.f32 %v1412_v9, %v1404_v38  ;;  %vm1439_vm10 = vcmp.eq.s32.totalorder %v3042_v23, inf }
 0x23a   : >> { %v1384_v63 = vsel %vm1383_vm12, %v1382_v17, %v1380_v8  ;;  %vm1440_vm11 = vmand %vm1438_vm6, %vm1439_vm10 }
 0x23b   : >> { %v1388_v42 = vsel %vm1387_vm14, nan, %v1384_v63  ;;  %v1414_v45 = vadd.f32 -0.14207031, %v1413_v55 }
 0x23c   : >> { %v1394_v14 = vsel %vm1393_vm0, %v1390_v19, %v1388_v42 }
 0x23d   : >> { %v1395_v36 = vand.u32 2147483647, %v1394_v14  ;;  %v1415_v13 = vmul.f32 %v1414_v45, %v1404_v38 }
 0x23f   : >> { %v1397_v28 = vor.u32 %v1396_v37, %v1395_v36  ;;  %v1416_v62 = vadd.f32 0.19993454, %v1415_v13 }
 0x241   : >> { %v1447_v24 = vmul.f32 %v1397_v28, %v299_v31  ;;  %v1417_v54 = vmul.f32 %v1416_v62, %v1404_v38 }
 0x243   : >> { %v1450_v15 = vadd.f32 %v1449_v41, %v1447_v24  ;;  %v1418_v48 = vadd.f32 -0.33333147, %v1417_v54 }
 0x245   : >> { %v1419_v20 = vmul.f32 %v1418_v48, %v1404_v38 }
 0x247   : >> { %v1420_v56 = vmul.f32 %v1419_v20, %v1403_v33 }
 0x249   : >> { %v1421_v12 = vadd.f32 %v1420_v56, %v1403_v33 }
 0x24b   : >> { %v1423_v10 = vsub.f32 1.5707964, %v1421_v12 }
 0x24d   : >> { %v1424_v25 = vsel %vm1422_vm2, %v1423_v10, %v1421_v12 }
 0x24e   : >> { %v1426_v11 = vsub.f32 3.1415927, %v1424_v25 }
 0x250   : >> { %v1427_v21 = vsel %vm1425_vm5, %v1426_v11, %v1424_v25 }
 0x251   : >> { %v1431_v33 = vsel %vm1430_vm7, %v1429_v34, %v1427_v21 }
 0x252   : >> { %v1435_v39 = vsel %vm1434_vm9, nan, %v1431_v33 }
 0x253   : >> { %v1441_v50 = vsel %vm1440_vm11, %v1437_v43, %v1435_v39 }
 0x254   : >> { %v1442_v1 = vand.u32 2147483647, %v1441_v50 }
 0x256   : >> { %v1444_v29 = vor.u32 %v1443_v47, %v1442_v1 }
 0x258   : >> { %v1448_v61 = vmul.f32 %v1444_v29, %v300_v26 }
 0x25a   : >> { %v1451_v38 = vadd.f32 %v1450_v15, %v1448_v61  ;;  %282 = sbr.rel (!%p280_p13) target bundleno = 236 (0xec), region = 111 }
 0x25c   : >> { %v1452_v49 = vadd.f32 %v1990_v6, %v1451_v38  }
 0x25e   : >> { %v3214_v6 = vmov %v1452_v49  ;;  %1453 = vst [vmem:[%s2238_s11] sm:$0xff] (%p280_p13), %v1452_v49 }
 0x25f   : > { %1923 = shalt.err (!%p1920_p12)
}
 0x260   : > { %s1924_s16 = scalar_lea.hbm %s1466_s8, 128  ;;  %s1928_s25 = scalar_lea.hbm %s3176_s3, 256 }
 0x261   : > { %p1925_p0 = scmp.ne.s32.totalorder %s1466_s8, %s1924_s16  ;;  %p1929_p2 = scmp.lt.s32.totalorder %s1466_s8, %s3176_s3 }
 0x262   : > { %p1930_p5 = scmp.lt.s32.totalorder %s1928_s25, %s1924_s16 }
 0x263   : > { %p1926_p11 = pnand %p1925_p0, %p3215_p8 }
 0x264   : > { %p1931_p13 = por %p1930_p5, %p1929_p2 }
 0x265   : > { %p1927_p4 = pneg %p1926_p11 }
 0x267   : > { %p1932_p7 = pnand %p1931_p13, %p1927_p4 }
 0x269   : > { %1935 = shalt.err (!%p1932_p7)
}
 0x26a   : > { %1691 = dma.vmem_to_hbm [thread:$0]  (%p3215_p8), %s1469_s29, 128, %s1466_s8, %s1455_s17  }
 0x26b PF: > { %s1480_s30 = sand.u32 1, %s1974_s12   ;;  %p3216_p10 = scmp.ne.s32.totalorder %s3187_s24, 0 }
 0x26c   : > { %p3217_p1 = scmp.ge.s32.totalorder %s1986_s15, 2  ;;  %s1481_s6 = scalar_lea.sflag [#allocation4], %s1480_s30 }
 0x26e   : > { %p1704_p3 = pnand %p3217_p1, %p3216_p10 }
 0x270   : > { %p1705_p9 = pneg %p1704_p3 }
 0x272   : > { %1969 = dma.done.wait (%p1705_p9), %s1481_s6, 128  }
 0x273   : > { %1971 = vsyncadd (%p1705_p9), %s1481_s6, 4294967168  ;;  %p19_p6 = scmp.ge.s32.totalorder %s2058_s18, 4   ;;  %s3218_s12 = smov %s1978_s13 }
 0x274   : > { %s3219_s13 = smov %s1982_s14  ;;  %s3220_s14 = smov %s2070_s21 }
 0x275   : > { %s3221_s15 = smov %s2058_s18  ;;  %21 = sbr.rel (!%p19_p6) target bundleno = 10 (0xa), region = 122 }
 0x27a   :  { %1486 = vsyncpa [#allocation3], 1 }
 0x27b   :  { %1488 = vsyncpa [#allocation3 + $0x1], 1 }
 0x27c   :  { %1489 = vsyncpa [#allocation6], 1 }
 0x27d   :  { %1491 = vsyncpa [#allocation6 + $0x1], 1 }
 0x27e   :  { %1492 = vsyncpa [#allocation4], 1 }
 0x27f   :  { %1494 = vsyncpa [#allocation4 + $0x1], 1 }

</bundles_post_ra>
